<compile_context>
chip_gen: v6e
topology: v6e:2x2x1
jax: 0.10.0
libtpu: 0.0.40
codegen_flags: <defaults>
</compile_context>

<pallas_src>
import functools

import numpy as np
import jax
import jax.numpy as jnp
from jax.experimental import pallas as pl
from jax.experimental.pallas import tpu as pltpu


# ----------------------------------------------------------------------------
# helpers
# ----------------------------------------------------------------------------
def _vmem_limit_bytes():
    """3/4 of physical VMEM (48 MiB on v7x, 96 MiB on v5e/v6e), capped."""
    cap = 64 * 1024 * 1024
    try:
        info = pltpu.get_tpu_info()
        cap = int(getattr(info, "vmem_capacity_bytes", cap) or cap)
    except Exception:  # pragma: no cover - defensive (interpret mode etc.)
        pass
    return min((cap * 3) // 4, 96 * 1024 * 1024)


def _bilinear_matrix(out_size, in_size):
    """PyTorch-equivalent bilinear interpolation matrix (align_corners=False)."""
    scale = in_size / out_size
    A = np.zeros((out_size, in_size), dtype=np.float32)
    for i in range(out_size):
        src = max((i + 0.5) * scale - 0.5, 0.0)
        i0 = min(int(np.floor(src)), in_size - 1)
        i1 = min(i0 + 1, in_size - 1)
        frac = src - i0
        A[i, i0] += 1.0 - frac
        A[i, i1] += frac
    return A


# ----------------------------------------------------------------------------
# in-kernel conv stage (shared by both kernels)
# ----------------------------------------------------------------------------
def _conv_planes(xph_ref, w_ref, b_ref, *, cin, cout, ho, wo, relu):
    """3x3 / stride-2 / pad-1 conv + bias + optional ReLU on the current tile.

    xph_ref holds the phase-decomposed, zero-padded input for one batch
    element: (1, 4*cin, ho+1, wo+1) bf16.  Returns `cout` f32 (ho, wo) planes.
    The 9*cin=36-term contraction is done as unrolled VPU multiply-adds with
    f32 scalar weights read from SMEM.
    """
    acc = [jnp.zeros((ho, wo), jnp.float32) for _ in range(cout)]
    for ph in range(2):
        kh_list = (0, 2) if ph == 0 else (1,)
        for pw in range(2):
            kw_list = (0, 2) if pw == 0 else (1,)
            p = ph * 2 + pw
            for c in range(cin):
                plane = xph_ref[0, p * cin + c].astype(jnp.float32)  # (ho+1, wo+1)
                # Hoist the lane-offset (ws) views: built once per plane and
                # reused by every kh tap of this phase (saves XLU rotates).
                lane_view = {kw // 2: plane[:, (kw // 2):(kw // 2) + wo]
                             for kw in kw_list}
                for kh in kh_list:
                    hs = kh // 2
                    for kw in kw_list:
                        t = lane_view[kw // 2][hs:hs + ho, :]        # (ho, wo)
                        r = (kh * 3 + kw) * cin + c
                        for co in range(cout):
                            acc[co] = acc[co] + w_ref[co, r] * t
    planes = []
    for co in range(cout):
        res = acc[co] + b_ref[co]
        if relu:                                   # final_act = nn.ReLU()
            res = jnp.maximum(res, 0.0)
        planes.append(res)
    return planes


# ----------------------------------------------------------------------------
# Kernel A: fused conv + bias + ReLU + bilinear rescale, written NCHW.
# ----------------------------------------------------------------------------
def _fused_conv_bilinear_kernel(xph_ref, w_ref, b_ref, ah_ref, awt_ref,
                                o_ref, conv_sc, *, cin, cout, ho, wo, relu):
    # xph_ref : (1, 4*cin, ho+1, wo+1) bf16   phase-decomposed padded input
    # w_ref   : (cout, 9*cin) f32  SMEM       column = (kh*3+kw)*cin + c
    # b_ref   : (cout,)       f32  SMEM
    # ah_ref  : (H, ho)  bf16                 H-pass interpolation matrix
    # awt_ref : (wo, W)  bf16                 W-pass interpolation matrix (transposed)
    # o_ref   : (1, cout, H, W) f32           NCHW output block
    # conv_sc : (cout*ho, wo) f32  VMEM       channel-stacked conv result
    planes = _conv_planes(xph_ref, w_ref, b_ref, cin=cin, cout=cout,
                          ho=ho, wo=wo, relu=relu)

    # Stack channels along sublanes (ho is a multiple of 8 -> aligned stores)
    # so the W-pass is ONE fat MXU dot over all channels.
    for co in range(cout):
        conv_sc[co * ho:(co + 1) * ho, :] = planes[co]

    wide = jnp.dot(conv_sc[...].astype(jnp.bfloat16), awt_ref[...],
                   preferred_element_type=jnp.float32)            # (cout*ho, W) f32

    ah = ah_ref[...]                                              # (H, ho) bf16
    for co in range(cout):
        t = wide[co * ho:(co + 1) * ho, :].astype(jnp.bfloat16)   # (ho, W)
        o_ref[0, co] = jnp.dot(ah, t,
                               preferred_element_type=jnp.float32)  # (H, W) f32
    # TODO(synk): for deployment widths < 128 lanes the final store is a
    # masked vst; a lane-dense (B, C, H*W) output slab would avoid that, but
    # it is moot for real images with W >= 128.


# ----------------------------------------------------------------------------
# Kernel B: conv-only path (rescale disabled or sizes already match).
# ----------------------------------------------------------------------------
def _conv_only_kernel(xph_ref, w_ref, b_ref, o_ref, *, cin, cout, ho, wo, relu):
    planes = _conv_planes(xph_ref, w_ref, b_ref, cin=cin, cout=cout,
                          ho=ho, wo=wo, relu=relu)
    for co in range(cout):
        o_ref[0, co] = planes[co]


# ----------------------------------------------------------------------------
# host-side wrapper reproducing SMPModelWrapper.forward semantics
# ----------------------------------------------------------------------------
def smp_wrapper_forward(x, conv_w, conv_b, *, rescale=True, relu=False,
                        squeeze_single_class=False):
    """x: NCHW f32 -> NCHW f32 (or (B,H,W) if squeezed)."""
    B, Cin, H, W = x.shape
    Cout = conv_w.shape[0]
    Ho = (H - 1) // 2 + 1                    # PyTorch conv output size (odd-safe)
    Wo = (W - 1) // 2 + 1

    # Host-side layout plumbing only (~input-sized data, fuses to one XLA copy):
    # zero-pad so every stride-2 phase has exactly (Ho+1, Wo+1) samples, split
    # into the 4 phases, fold them into the channel axis, stream as bf16.
    # TODO(synk): fold the H-phase split into the kernel with sublane-strided
    # reads (pl.ds(..., stride=2)) to shave the remaining host relayout pass.
    Hp, Wp = 2 * (Ho + 1), 2 * (Wo + 1)
    xp = jnp.pad(x, ((0, 0), (0, 0), (1, Hp - H - 1), (1, Wp - W - 1)))
    xph = xp.reshape(B, Cin, Ho + 1, 2, Wo + 1, 2)
    xph = xph.transpose(0, 3, 5, 1, 2, 4).reshape(B, 4 * Cin, Ho + 1, Wo + 1)
    xph = xph.astype(jnp.bfloat16)

    # weight layout matching the in-kernel tap order: column = (kh*3+kw)*Cin + c
    wmat = conv_w.transpose(0, 2, 3, 1).reshape(Cout, 9 * Cin).astype(jnp.float32)
    bias = conv_b.reshape(Cout).astype(jnp.float32)

    vmem_limit = _vmem_limit_bytes()
    need_resize = rescale and (Ho, Wo) != (H, W)

    if need_resize:
        ah = jnp.asarray(_bilinear_matrix(H, Ho), dtype=jnp.bfloat16)      # (H, Ho)
        awt = jnp.asarray(_bilinear_matrix(W, Wo).T, dtype=jnp.bfloat16)   # (Wo, W)
        out = pl.pallas_call(
            functools.partial(_fused_conv_bilinear_kernel, cin=Cin, cout=Cout,
                              ho=Ho, wo=Wo, relu=relu),
            grid=(B,),
            out_shape=jax.ShapeDtypeStruct((B, Cout, H, W), jnp.float32),
            in_specs=[
                pl.BlockSpec((1, 4 * Cin, Ho + 1, Wo + 1), lambda i: (i, 0, 0, 0)),
                pl.BlockSpec(memory_space=pltpu.MemorySpace.SMEM),  # weights
                pl.BlockSpec(memory_space=pltpu.MemorySpace.SMEM),  # bias
                pl.BlockSpec((H, Ho), lambda i: (0, 0)),            # ah (resident)
                pl.BlockSpec((Wo, W), lambda i: (0, 0)),            # awt (resident)
            ],
            out_specs=pl.BlockSpec((1, Cout, H, W), lambda i: (i, 0, 0, 0)),
            scratch_shapes=[pltpu.VMEM((Cout * Ho, Wo), jnp.float32)],
            compiler_params=pltpu.CompilerParams(
                dimension_semantics=("parallel",),
                vmem_limit_bytes=vmem_limit),
        )(xph, wmat, bias, ah, awt)
    else:
        out = pl.pallas_call(
            functools.partial(_conv_only_kernel, cin=Cin, cout=Cout,
                              ho=Ho, wo=Wo, relu=relu),
            grid=(B,),
            out_shape=jax.ShapeDtypeStruct((B, Cout, Ho, Wo), jnp.float32),
            in_specs=[
                pl.BlockSpec((1, 4 * Cin, Ho + 1, Wo + 1), lambda i: (i, 0, 0, 0)),
                pl.BlockSpec(memory_space=pltpu.MemorySpace.SMEM),
                pl.BlockSpec(memory_space=pltpu.MemorySpace.SMEM),
            ],
            out_specs=pl.BlockSpec((1, Cout, Ho, Wo), lambda i: (i, 0, 0, 0)),
            compiler_params=pltpu.CompilerParams(
                dimension_semantics=("parallel",),
                vmem_limit_bytes=vmem_limit),
        )(xph, wmat, bias)

    # PyTorch squeezes BEFORE rescale; per-channel interpolation makes the two
    # orders equivalent for the single-class case (and avoids a 3-D interpolate).
    if out.shape[1] == 1 and squeeze_single_class:
        out = jnp.squeeze(out, axis=1)
    return out                                       # ModelOutput -> raw array


class SMPModelWrapperPallas:
    """Pallas port of terratorch SMPModelWrapper (forward only)."""

    def __init__(self, conv_w, conv_b, rescale=True, relu=False,
                 squeeze_single_class=False):
        self.conv_w = conv_w
        self.conv_b = conv_b
        self.rescale = rescale
        self.relu = relu                     # final_act: ReLU if relu else Identity
        self.squeeze_single_class = squeeze_single_class
        # TODO(synk): freeze_encoder / freeze_decoder are training-time no-ops
        # for a forward-only Pallas kernel (no grad state to freeze).
        # TODO(synk): the (smp_output, labels) tuple branch of forward() does
        # not apply here (the synthetic smp_model returns a single tensor).

    def __call__(self, x):
        return smp_wrapper_forward(
            x, self.conv_w, self.conv_b, rescale=self.rescale, relu=self.relu,
            squeeze_single_class=self.squeeze_single_class)


if __name__ == "__main__":
    key = jax.random.PRNGKey(0)
    kx, kw, kb = jax.random.split(key, 3)

    B, Cin, H, W = 2, 4, 16, 16
    Cout = 3

    x = jax.random.normal(kx, (B, Cin, H, W), dtype=jnp.float32)
    conv_w = 0.1 * jax.random.normal(kw, (Cout, Cin, 3, 3), dtype=jnp.float32)
    conv_b = 0.1 * jax.random.normal(kb, (Cout,), dtype=jnp.float32)

    model = SMPModelWrapperPallas(conv_w, conv_b, rescale=True, relu=True,
                                  squeeze_single_class=False)
    out = jax.block_until_ready(model(x))

    # pure-JAX f32 reference of the same forward (conv + bias + ReLU + bilinear)
    ref_conv = jax.lax.conv_general_dilated(
        x, conv_w, window_strides=(2, 2), padding=((1, 1), (1, 1)),
        dimension_numbers=("NCHW", "OIHW", "NCHW"))
    ref_conv = jnp.maximum(ref_conv + conv_b.reshape(1, Cout, 1, 1), 0.0)
    ah_f32 = jnp.asarray(_bilinear_matrix(H, ref_conv.shape[2]))
    aw_f32 = jnp.asarray(_bilinear_matrix(W, ref_conv.shape[3]))
    ref = jnp.einsum("hi,bciw,vw->bchv", ah_f32, ref_conv, aw_f32)

    assert out.shape == (B, Cout, H, W), out.shape
    assert out.dtype == jnp.float32
    assert bool(jnp.all(out >= 0.0))                  # ReLU applied before upsample
    max_err = float(jnp.max(jnp.abs(out - ref)))
    assert max_err < 5e-2, max_err                    # bf16-stream tolerance
    print("KERNEL_OK")
</pallas_src>

<mosaic_0001>
module attributes {stable_mosaic.version = 11 : i64} {
  func.func @_fused_conv_bilinear_kernel(%arg0: i32, %arg1: memref<1x16x9x9xbf16, #tpu.memory_space<vmem>>, %arg2: memref<3x36xf32, #tpu.memory_space<smem>>, %arg3: memref<3xf32, #tpu.memory_space<smem>>, %arg4: memref<16x8xbf16, #tpu.memory_space<vmem>>, %arg5: memref<8x16xbf16, #tpu.memory_space<vmem>>, %arg6: memref<1x3x16x16xf32, #tpu.memory_space<vmem>>, %arg7: memref<24x8xf32, #tpu.memory_space<vmem>>) attributes {dimension_semantics = [#tpu.dimension_semantics<parallel>], iteration_bounds = array<i64: 2>, scalar_prefetch = 0 : i64, scratch_operands = 1 : i64, tpu.core_type = #tpu.core_type<tc>, window_params = [{transform_indices = @transform_0, window_bounds = array<i64: 1, 16, 9, 9>}, {transform_indices = @transform_1, window_bounds = array<i64: 3, 36>}, {transform_indices = @transform_2, window_bounds = array<i64: 3>}, {pipeline_mode = #tpu.pipeline_mode<synchronous>, transform_indices = @transform_3, window_bounds = array<i64: 16, 8>}, {pipeline_mode = #tpu.pipeline_mode<synchronous>, transform_indices = @transform_4, window_bounds = array<i64: 8, 16>}, {transform_indices = @transform_5, window_bounds = array<i64: 1, 3, 16, 16>}]} {
    %cst = arith.constant 0.000000e+00 : f32
    %0 = vector.broadcast %cst : f32 to vector<8x8xf32>
    %cst_0 = arith.constant 0.000000e+00 : f32
    %1 = vector.broadcast %cst_0 : f32 to vector<8x8xf32>
    %cst_1 = arith.constant 0.000000e+00 : f32
    %2 = vector.broadcast %cst_1 : f32 to vector<8x8xf32>
    %c0 = arith.constant 0 : index
    %c0_2 = arith.constant 0 : index
    %c0_3 = arith.constant 0 : index
    %c0_4 = arith.constant 0 : index
    %3 = vector.load %arg1[%c0, %c0_2, %c0_3, %c0_4] : memref<1x16x9x9xbf16, #tpu.memory_space<vmem>>, vector<1x1x9x9xbf16>
    %4 = vector.shape_cast %3 : vector<1x1x9x9xbf16> to vector<9x9xbf16>
    %5 = arith.extf %4 : vector<9x9xbf16> to vector<9x9xf32>
    %6 = vector.extract_strided_slice %5 {offsets = [0, 0], sizes = [9, 8], strides = [1, 1]} : vector<9x9xf32> to vector<9x8xf32>
    %7 = vector.extract_strided_slice %5 {offsets = [0, 1], sizes = [9, 8], strides = [1, 1]} : vector<9x9xf32> to vector<9x8xf32>
    %8 = vector.extract_strided_slice %6 {offsets = [0, 0], sizes = [8, 8], strides = [1, 1]} : vector<9x8xf32> to vector<8x8xf32>
    %c0_5 = arith.constant 0 : index
    %c0_6 = arith.constant 0 : index
    %9 = memref.load %arg2[%c0_5, %c0_6] : memref<3x36xf32, #tpu.memory_space<smem>>
    %10 = vector.broadcast %9 : f32 to vector<8x8xf32>
    %11 = arith.mulf %10, %8 : vector<8x8xf32>
    %12 = arith.addf %0, %11 : vector<8x8xf32>
    %c1 = arith.constant 1 : index
    %c0_7 = arith.constant 0 : index
    %13 = memref.load %arg2[%c1, %c0_7] : memref<3x36xf32, #tpu.memory_space<smem>>
    %14 = vector.broadcast %13 : f32 to vector<8x8xf32>
    %15 = arith.mulf %14, %8 : vector<8x8xf32>
    %16 = arith.addf %1, %15 : vector<8x8xf32>
    %c2 = arith.constant 2 : index
    %c0_8 = arith.constant 0 : index
    %17 = memref.load %arg2[%c2, %c0_8] : memref<3x36xf32, #tpu.memory_space<smem>>
    %18 = vector.broadcast %17 : f32 to vector<8x8xf32>
    %19 = arith.mulf %18, %8 : vector<8x8xf32>
    %20 = arith.addf %2, %19 : vector<8x8xf32>
    %21 = vector.extract_strided_slice %7 {offsets = [0, 0], sizes = [8, 8], strides = [1, 1]} : vector<9x8xf32> to vector<8x8xf32>
    %c0_9 = arith.constant 0 : index
    %c8 = arith.constant 8 : index
    %22 = memref.load %arg2[%c0_9, %c8] : memref<3x36xf32, #tpu.memory_space<smem>>
    %23 = vector.broadcast %22 : f32 to vector<8x8xf32>
    %24 = arith.mulf %23, %21 : vector<8x8xf32>
    %25 = arith.addf %12, %24 : vector<8x8xf32>
    %c1_10 = arith.constant 1 : index
    %c8_11 = arith.constant 8 : index
    %26 = memref.load %arg2[%c1_10, %c8_11] : memref<3x36xf32, #tpu.memory_space<smem>>
    %27 = vector.broadcast %26 : f32 to vector<8x8xf32>
    %28 = arith.mulf %27, %21 : vector<8x8xf32>
    %29 = arith.addf %16, %28 : vector<8x8xf32>
    %c2_12 = arith.constant 2 : index
    %c8_13 = arith.constant 8 : index
    %30 = memref.load %arg2[%c2_12, %c8_13] : memref<3x36xf32, #tpu.memory_space<smem>>
    %31 = vector.broadcast %30 : f32 to vector<8x8xf32>
    %32 = arith.mulf %31, %21 : vector<8x8xf32>
    %33 = arith.addf %20, %32 : vector<8x8xf32>
    %34 = vector.extract_strided_slice %6 {offsets = [1, 0], sizes = [8, 8], strides = [1, 1]} : vector<9x8xf32> to vector<8x8xf32>
    %c0_14 = arith.constant 0 : index
    %c24 = arith.constant 24 : index
    %35 = memref.load %arg2[%c0_14, %c24] : memref<3x36xf32, #tpu.memory_space<smem>>
    %36 = vector.broadcast %35 : f32 to vector<8x8xf32>
    %37 = arith.mulf %36, %34 : vector<8x8xf32>
    %38 = arith.addf %25, %37 : vector<8x8xf32>
    %c1_15 = arith.constant 1 : index
    %c24_16 = arith.constant 24 : index
    %39 = memref.load %arg2[%c1_15, %c24_16] : memref<3x36xf32, #tpu.memory_space<smem>>
    %40 = vector.broadcast %39 : f32 to vector<8x8xf32>
    %41 = arith.mulf %40, %34 : vector<8x8xf32>
    %42 = arith.addf %29, %41 : vector<8x8xf32>
    %c2_17 = arith.constant 2 : index
    %c24_18 = arith.constant 24 : index
    %43 = memref.load %arg2[%c2_17, %c24_18] : memref<3x36xf32, #tpu.memory_space<smem>>
    %44 = vector.broadcast %43 : f32 to vector<8x8xf32>
    %45 = arith.mulf %44, %34 : vector<8x8xf32>
    %46 = arith.addf %33, %45 : vector<8x8xf32>
    %47 = vector.extract_strided_slice %7 {offsets = [1, 0], sizes = [8, 8], strides = [1, 1]} : vector<9x8xf32> to vector<8x8xf32>
    %c0_19 = arith.constant 0 : index
    %c32 = arith.constant 32 : index
    %48 = memref.load %arg2[%c0_19, %c32] : memref<3x36xf32, #tpu.memory_space<smem>>
    %49 = vector.broadcast %48 : f32 to vector<8x8xf32>
    %50 = arith.mulf %49, %47 : vector<8x8xf32>
    %51 = arith.addf %38, %50 : vector<8x8xf32>
    %c1_20 = arith.constant 1 : index
    %c32_21 = arith.constant 32 : index
    %52 = memref.load %arg2[%c1_20, %c32_21] : memref<3x36xf32, #tpu.memory_space<smem>>
    %53 = vector.broadcast %52 : f32 to vector<8x8xf32>
    %54 = arith.mulf %53, %47 : vector<8x8xf32>
    %55 = arith.addf %42, %54 : vector<8x8xf32>
    %c2_22 = arith.constant 2 : index
    %c32_23 = arith.constant 32 : index
    %56 = memref.load %arg2[%c2_22, %c32_23] : memref<3x36xf32, #tpu.memory_space<smem>>
    %57 = vector.broadcast %56 : f32 to vector<8x8xf32>
    %58 = arith.mulf %57, %47 : vector<8x8xf32>
    %59 = arith.addf %46, %58 : vector<8x8xf32>
    %c0_24 = arith.constant 0 : index
    %c1_25 = arith.constant 1 : index
    %c0_26 = arith.constant 0 : index
    %c0_27 = arith.constant 0 : index
    %60 = vector.load %arg1[%c0_24, %c1_25, %c0_26, %c0_27] : memref<1x16x9x9xbf16, #tpu.memory_space<vmem>>, vector<1x1x9x9xbf16>
    %61 = vector.shape_cast %60 : vector<1x1x9x9xbf16> to vector<9x9xbf16>
    %62 = arith.extf %61 : vector<9x9xbf16> to vector<9x9xf32>
    %63 = vector.extract_strided_slice %62 {offsets = [0, 0], sizes = [9, 8], strides = [1, 1]} : vector<9x9xf32> to vector<9x8xf32>
    %64 = vector.extract_strided_slice %62 {offsets = [0, 1], sizes = [9, 8], strides = [1, 1]} : vector<9x9xf32> to vector<9x8xf32>
    %65 = vector.extract_strided_slice %63 {offsets = [0, 0], sizes = [8, 8], strides = [1, 1]} : vector<9x8xf32> to vector<8x8xf32>
    %c0_28 = arith.constant 0 : index
    %c1_29 = arith.constant 1 : index
    %66 = memref.load %arg2[%c0_28, %c1_29] : memref<3x36xf32, #tpu.memory_space<smem>>
    %67 = vector.broadcast %66 : f32 to vector<8x8xf32>
    %68 = arith.mulf %67, %65 : vector<8x8xf32>
    %69 = arith.addf %51, %68 : vector<8x8xf32>
    %c1_30 = arith.constant 1 : index
    %c1_31 = arith.constant 1 : index
    %70 = memref.load %arg2[%c1_30, %c1_31] : memref<3x36xf32, #tpu.memory_space<smem>>
    %71 = vector.broadcast %70 : f32 to vector<8x8xf32>
    %72 = arith.mulf %71, %65 : vector<8x8xf32>
    %73 = arith.addf %55, %72 : vector<8x8xf32>
    %c2_32 = arith.constant 2 : index
    %c1_33 = arith.constant 1 : index
    %74 = memref.load %arg2[%c2_32, %c1_33] : memref<3x36xf32, #tpu.memory_space<smem>>
    %75 = vector.broadcast %74 : f32 to vector<8x8xf32>
    %76 = arith.mulf %75, %65 : vector<8x8xf32>
    %77 = arith.addf %59, %76 : vector<8x8xf32>
    %78 = vector.extract_strided_slice %64 {offsets = [0, 0], sizes = [8, 8], strides = [1, 1]} : vector<9x8xf32> to vector<8x8xf32>
    %c0_34 = arith.constant 0 : index
    %c9 = arith.constant 9 : index
    %79 = memref.load %arg2[%c0_34, %c9] : memref<3x36xf32, #tpu.memory_space<smem>>
    %80 = vector.broadcast %79 : f32 to vector<8x8xf32>
    %81 = arith.mulf %80, %78 : vector<8x8xf32>
    %82 = arith.addf %69, %81 : vector<8x8xf32>
    %c1_35 = arith.constant 1 : index
    %c9_36 = arith.constant 9 : index
    %83 = memref.load %arg2[%c1_35, %c9_36] : memref<3x36xf32, #tpu.memory_space<smem>>
    %84 = vector.broadcast %83 : f32 to vector<8x8xf32>
    %85 = arith.mulf %84, %78 : vector<8x8xf32>
    %86 = arith.addf %73, %85 : vector<8x8xf32>
    %c2_37 = arith.constant 2 : index
    %c9_38 = arith.constant 9 : index
    %87 = memref.load %arg2[%c2_37, %c9_38] : memref<3x36xf32, #tpu.memory_space<smem>>
    %88 = vector.broadcast %87 : f32 to vector<8x8xf32>
    %89 = arith.mulf %88, %78 : vector<8x8xf32>
    %90 = arith.addf %77, %89 : vector<8x8xf32>
    %91 = vector.extract_strided_slice %63 {offsets = [1, 0], sizes = [8, 8], strides = [1, 1]} : vector<9x8xf32> to vector<8x8xf32>
    %c0_39 = arith.constant 0 : index
    %c25 = arith.constant 25 : index
    %92 = memref.load %arg2[%c0_39, %c25] : memref<3x36xf32, #tpu.memory_space<smem>>
    %93 = vector.broadcast %92 : f32 to vector<8x8xf32>
    %94 = arith.mulf %93, %91 : vector<8x8xf32>
    %95 = arith.addf %82, %94 : vector<8x8xf32>
    %c1_40 = arith.constant 1 : index
    %c25_41 = arith.constant 25 : index
    %96 = memref.load %arg2[%c1_40, %c25_41] : memref<3x36xf32, #tpu.memory_space<smem>>
    %97 = vector.broadcast %96 : f32 to vector<8x8xf32>
    %98 = arith.mulf %97, %91 : vector<8x8xf32>
    %99 = arith.addf %86, %98 : vector<8x8xf32>
    %c2_42 = arith.constant 2 : index
    %c25_43 = arith.constant 25 : index
    %100 = memref.load %arg2[%c2_42, %c25_43] : memref<3x36xf32, #tpu.memory_space<smem>>
    %101 = vector.broadcast %100 : f32 to vector<8x8xf32>
    %102 = arith.mulf %101, %91 : vector<8x8xf32>
    %103 = arith.addf %90, %102 : vector<8x8xf32>
    %104 = vector.extract_strided_slice %64 {offsets = [1, 0], sizes = [8, 8], strides = [1, 1]} : vector<9x8xf32> to vector<8x8xf32>
    %c0_44 = arith.constant 0 : index
    %c33 = arith.constant 33 : index
    %105 = memref.load %arg2[%c0_44, %c33] : memref<3x36xf32, #tpu.memory_space<smem>>
    %106 = vector.broadcast %105 : f32 to vector<8x8xf32>
    %107 = arith.mulf %106, %104 : vector<8x8xf32>
    %108 = arith.addf %95, %107 : vector<8x8xf32>
    %c1_45 = arith.constant 1 : index
    %c33_46 = arith.constant 33 : index
    %109 = memref.load %arg2[%c1_45, %c33_46] : memref<3x36xf32, #tpu.memory_space<smem>>
    %110 = vector.broadcast %109 : f32 to vector<8x8xf32>
    %111 = arith.mulf %110, %104 : vector<8x8xf32>
    %112 = arith.addf %99, %111 : vector<8x8xf32>
    %c2_47 = arith.constant 2 : index
    %c33_48 = arith.constant 33 : index
    %113 = memref.load %arg2[%c2_47, %c33_48] : memref<3x36xf32, #tpu.memory_space<smem>>
    %114 = vector.broadcast %113 : f32 to vector<8x8xf32>
    %115 = arith.mulf %114, %104 : vector<8x8xf32>
    %116 = arith.addf %103, %115 : vector<8x8xf32>
    %c0_49 = arith.constant 0 : index
    %c2_50 = arith.constant 2 : index
    %c0_51 = arith.constant 0 : index
    %c0_52 = arith.constant 0 : index
    %117 = vector.load %arg1[%c0_49, %c2_50, %c0_51, %c0_52] : memref<1x16x9x9xbf16, #tpu.memory_space<vmem>>, vector<1x1x9x9xbf16>
    %118 = vector.shape_cast %117 : vector<1x1x9x9xbf16> to vector<9x9xbf16>
    %119 = arith.extf %118 : vector<9x9xbf16> to vector<9x9xf32>
    %120 = vector.extract_strided_slice %119 {offsets = [0, 0], sizes = [9, 8], strides = [1, 1]} : vector<9x9xf32> to vector<9x8xf32>
    %121 = vector.extract_strided_slice %119 {offsets = [0, 1], sizes = [9, 8], strides = [1, 1]} : vector<9x9xf32> to vector<9x8xf32>
    %122 = vector.extract_strided_slice %120 {offsets = [0, 0], sizes = [8, 8], strides = [1, 1]} : vector<9x8xf32> to vector<8x8xf32>
    %c0_53 = arith.constant 0 : index
    %c2_54 = arith.constant 2 : index
    %123 = memref.load %arg2[%c0_53, %c2_54] : memref<3x36xf32, #tpu.memory_space<smem>>
    %124 = vector.broadcast %123 : f32 to vector<8x8xf32>
    %125 = arith.mulf %124, %122 : vector<8x8xf32>
    %126 = arith.addf %108, %125 : vector<8x8xf32>
    %c1_55 = arith.constant 1 : index
    %c2_56 = arith.constant 2 : index
    %127 = memref.load %arg2[%c1_55, %c2_56] : memref<3x36xf32, #tpu.memory_space<smem>>
    %128 = vector.broadcast %127 : f32 to vector<8x8xf32>
    %129 = arith.mulf %128, %122 : vector<8x8xf32>
    %130 = arith.addf %112, %129 : vector<8x8xf32>
    %c2_57 = arith.constant 2 : index
    %c2_58 = arith.constant 2 : index
    %131 = memref.load %arg2[%c2_57, %c2_58] : memref<3x36xf32, #tpu.memory_space<smem>>
    %132 = vector.broadcast %131 : f32 to vector<8x8xf32>
    %133 = arith.mulf %132, %122 : vector<8x8xf32>
    %134 = arith.addf %116, %133 : vector<8x8xf32>
    %135 = vector.extract_strided_slice %121 {offsets = [0, 0], sizes = [8, 8], strides = [1, 1]} : vector<9x8xf32> to vector<8x8xf32>
    %c0_59 = arith.constant 0 : index
    %c10 = arith.constant 10 : index
    %136 = memref.load %arg2[%c0_59, %c10] : memref<3x36xf32, #tpu.memory_space<smem>>
    %137 = vector.broadcast %136 : f32 to vector<8x8xf32>
    %138 = arith.mulf %137, %135 : vector<8x8xf32>
    %139 = arith.addf %126, %138 : vector<8x8xf32>
    %c1_60 = arith.constant 1 : index
    %c10_61 = arith.constant 10 : index
    %140 = memref.load %arg2[%c1_60, %c10_61] : memref<3x36xf32, #tpu.memory_space<smem>>
    %141 = vector.broadcast %140 : f32 to vector<8x8xf32>
    %142 = arith.mulf %141, %135 : vector<8x8xf32>
    %143 = arith.addf %130, %142 : vector<8x8xf32>
    %c2_62 = arith.constant 2 : index
    %c10_63 = arith.constant 10 : index
    %144 = memref.load %arg2[%c2_62, %c10_63] : memref<3x36xf32, #tpu.memory_space<smem>>
    %145 = vector.broadcast %144 : f32 to vector<8x8xf32>
    %146 = arith.mulf %145, %135 : vector<8x8xf32>
    %147 = arith.addf %134, %146 : vector<8x8xf32>
    %148 = vector.extract_strided_slice %120 {offsets = [1, 0], sizes = [8, 8], strides = [1, 1]} : vector<9x8xf32> to vector<8x8xf32>
    %c0_64 = arith.constant 0 : index
    %c26 = arith.constant 26 : index
    %149 = memref.load %arg2[%c0_64, %c26] : memref<3x36xf32, #tpu.memory_space<smem>>
    %150 = vector.broadcast %149 : f32 to vector<8x8xf32>
    %151 = arith.mulf %150, %148 : vector<8x8xf32>
    %152 = arith.addf %139, %151 : vector<8x8xf32>
    %c1_65 = arith.constant 1 : index
    %c26_66 = arith.constant 26 : index
    %153 = memref.load %arg2[%c1_65, %c26_66] : memref<3x36xf32, #tpu.memory_space<smem>>
    %154 = vector.broadcast %153 : f32 to vector<8x8xf32>
    %155 = arith.mulf %154, %148 : vector<8x8xf32>
    %156 = arith.addf %143, %155 : vector<8x8xf32>
    %c2_67 = arith.constant 2 : index
    %c26_68 = arith.constant 26 : index
    %157 = memref.load %arg2[%c2_67, %c26_68] : memref<3x36xf32, #tpu.memory_space<smem>>
    %158 = vector.broadcast %157 : f32 to vector<8x8xf32>
    %159 = arith.mulf %158, %148 : vector<8x8xf32>
    %160 = arith.addf %147, %159 : vector<8x8xf32>
    %161 = vector.extract_strided_slice %121 {offsets = [1, 0], sizes = [8, 8], strides = [1, 1]} : vector<9x8xf32> to vector<8x8xf32>
    %c0_69 = arith.constant 0 : index
    %c34 = arith.constant 34 : index
    %162 = memref.load %arg2[%c0_69, %c34] : memref<3x36xf32, #tpu.memory_space<smem>>
    %163 = vector.broadcast %162 : f32 to vector<8x8xf32>
    %164 = arith.mulf %163, %161 : vector<8x8xf32>
    %165 = arith.addf %152, %164 : vector<8x8xf32>
    %c1_70 = arith.constant 1 : index
    %c34_71 = arith.constant 34 : index
    %166 = memref.load %arg2[%c1_70, %c34_71] : memref<3x36xf32, #tpu.memory_space<smem>>
    %167 = vector.broadcast %166 : f32 to vector<8x8xf32>
    %168 = arith.mulf %167, %161 : vector<8x8xf32>
    %169 = arith.addf %156, %168 : vector<8x8xf32>
    %c2_72 = arith.constant 2 : index
    %c34_73 = arith.constant 34 : index
    %170 = memref.load %arg2[%c2_72, %c34_73] : memref<3x36xf32, #tpu.memory_space<smem>>
    %171 = vector.broadcast %170 : f32 to vector<8x8xf32>
    %172 = arith.mulf %171, %161 : vector<8x8xf32>
    %173 = arith.addf %160, %172 : vector<8x8xf32>
    %c0_74 = arith.constant 0 : index
    %c3 = arith.constant 3 : index
    %c0_75 = arith.constant 0 : index
    %c0_76 = arith.constant 0 : index
    %174 = vector.load %arg1[%c0_74, %c3, %c0_75, %c0_76] : memref<1x16x9x9xbf16, #tpu.memory_space<vmem>>, vector<1x1x9x9xbf16>
    %175 = vector.shape_cast %174 : vector<1x1x9x9xbf16> to vector<9x9xbf16>
    %176 = arith.extf %175 : vector<9x9xbf16> to vector<9x9xf32>
    %177 = vector.extract_strided_slice %176 {offsets = [0, 0], sizes = [9, 8], strides = [1, 1]} : vector<9x9xf32> to vector<9x8xf32>
    %178 = vector.extract_strided_slice %176 {offsets = [0, 1], sizes = [9, 8], strides = [1, 1]} : vector<9x9xf32> to vector<9x8xf32>
    %179 = vector.extract_strided_slice %177 {offsets = [0, 0], sizes = [8, 8], strides = [1, 1]} : vector<9x8xf32> to vector<8x8xf32>
    %c0_77 = arith.constant 0 : index
    %c3_78 = arith.constant 3 : index
    %180 = memref.load %arg2[%c0_77, %c3_78] : memref<3x36xf32, #tpu.memory_space<smem>>
    %181 = vector.broadcast %180 : f32 to vector<8x8xf32>
    %182 = arith.mulf %181, %179 : vector<8x8xf32>
    %183 = arith.addf %165, %182 : vector<8x8xf32>
    %c1_79 = arith.constant 1 : index
    %c3_80 = arith.constant 3 : index
    %184 = memref.load %arg2[%c1_79, %c3_80] : memref<3x36xf32, #tpu.memory_space<smem>>
    %185 = vector.broadcast %184 : f32 to vector<8x8xf32>
    %186 = arith.mulf %185, %179 : vector<8x8xf32>
    %187 = arith.addf %169, %186 : vector<8x8xf32>
    %c2_81 = arith.constant 2 : index
    %c3_82 = arith.constant 3 : index
    %188 = memref.load %arg2[%c2_81, %c3_82] : memref<3x36xf32, #tpu.memory_space<smem>>
    %189 = vector.broadcast %188 : f32 to vector<8x8xf32>
    %190 = arith.mulf %189, %179 : vector<8x8xf32>
    %191 = arith.addf %173, %190 : vector<8x8xf32>
    %192 = vector.extract_strided_slice %178 {offsets = [0, 0], sizes = [8, 8], strides = [1, 1]} : vector<9x8xf32> to vector<8x8xf32>
    %c0_83 = arith.constant 0 : index
    %c11 = arith.constant 11 : index
    %193 = memref.load %arg2[%c0_83, %c11] : memref<3x36xf32, #tpu.memory_space<smem>>
    %194 = vector.broadcast %193 : f32 to vector<8x8xf32>
    %195 = arith.mulf %194, %192 : vector<8x8xf32>
    %196 = arith.addf %183, %195 : vector<8x8xf32>
    %c1_84 = arith.constant 1 : index
    %c11_85 = arith.constant 11 : index
    %197 = memref.load %arg2[%c1_84, %c11_85] : memref<3x36xf32, #tpu.memory_space<smem>>
    %198 = vector.broadcast %197 : f32 to vector<8x8xf32>
    %199 = arith.mulf %198, %192 : vector<8x8xf32>
    %200 = arith.addf %187, %199 : vector<8x8xf32>
    %c2_86 = arith.constant 2 : index
    %c11_87 = arith.constant 11 : index
    %201 = memref.load %arg2[%c2_86, %c11_87] : memref<3x36xf32, #tpu.memory_space<smem>>
    %202 = vector.broadcast %201 : f32 to vector<8x8xf32>
    %203 = arith.mulf %202, %192 : vector<8x8xf32>
    %204 = arith.addf %191, %203 : vector<8x8xf32>
    %205 = vector.extract_strided_slice %177 {offsets = [1, 0], sizes = [8, 8], strides = [1, 1]} : vector<9x8xf32> to vector<8x8xf32>
    %c0_88 = arith.constant 0 : index
    %c27 = arith.constant 27 : index
    %206 = memref.load %arg2[%c0_88, %c27] : memref<3x36xf32, #tpu.memory_space<smem>>
    %207 = vector.broadcast %206 : f32 to vector<8x8xf32>
    %208 = arith.mulf %207, %205 : vector<8x8xf32>
    %209 = arith.addf %196, %208 : vector<8x8xf32>
    %c1_89 = arith.constant 1 : index
    %c27_90 = arith.constant 27 : index
    %210 = memref.load %arg2[%c1_89, %c27_90] : memref<3x36xf32, #tpu.memory_space<smem>>
    %211 = vector.broadcast %210 : f32 to vector<8x8xf32>
    %212 = arith.mulf %211, %205 : vector<8x8xf32>
    %213 = arith.addf %200, %212 : vector<8x8xf32>
    %c2_91 = arith.constant 2 : index
    %c27_92 = arith.constant 27 : index
    %214 = memref.load %arg2[%c2_91, %c27_92] : memref<3x36xf32, #tpu.memory_space<smem>>
    %215 = vector.broadcast %214 : f32 to vector<8x8xf32>
    %216 = arith.mulf %215, %205 : vector<8x8xf32>
    %217 = arith.addf %204, %216 : vector<8x8xf32>
    %218 = vector.extract_strided_slice %178 {offsets = [1, 0], sizes = [8, 8], strides = [1, 1]} : vector<9x8xf32> to vector<8x8xf32>
    %c0_93 = arith.constant 0 : index
    %c35 = arith.constant 35 : index
    %219 = memref.load %arg2[%c0_93, %c35] : memref<3x36xf32, #tpu.memory_space<smem>>
    %220 = vector.broadcast %219 : f32 to vector<8x8xf32>
    %221 = arith.mulf %220, %218 : vector<8x8xf32>
    %222 = arith.addf %209, %221 : vector<8x8xf32>
    %c1_94 = arith.constant 1 : index
    %c35_95 = arith.constant 35 : index
    %223 = memref.load %arg2[%c1_94, %c35_95] : memref<3x36xf32, #tpu.memory_space<smem>>
    %224 = vector.broadcast %223 : f32 to vector<8x8xf32>
    %225 = arith.mulf %224, %218 : vector<8x8xf32>
    %226 = arith.addf %213, %225 : vector<8x8xf32>
    %c2_96 = arith.constant 2 : index
    %c35_97 = arith.constant 35 : index
    %227 = memref.load %arg2[%c2_96, %c35_97] : memref<3x36xf32, #tpu.memory_space<smem>>
    %228 = vector.broadcast %227 : f32 to vector<8x8xf32>
    %229 = arith.mulf %228, %218 : vector<8x8xf32>
    %230 = arith.addf %217, %229 : vector<8x8xf32>
    %c0_98 = arith.constant 0 : index
    %c4 = arith.constant 4 : index
    %c0_99 = arith.constant 0 : index
    %c0_100 = arith.constant 0 : index
    %231 = vector.load %arg1[%c0_98, %c4, %c0_99, %c0_100] : memref<1x16x9x9xbf16, #tpu.memory_space<vmem>>, vector<1x1x9x9xbf16>
    %232 = vector.shape_cast %231 : vector<1x1x9x9xbf16> to vector<9x9xbf16>
    %233 = arith.extf %232 : vector<9x9xbf16> to vector<9x9xf32>
    %234 = vector.extract_strided_slice %233 {offsets = [0, 0], sizes = [9, 8], strides = [1, 1]} : vector<9x9xf32> to vector<9x8xf32>
    %235 = vector.extract_strided_slice %234 {offsets = [0, 0], sizes = [8, 8], strides = [1, 1]} : vector<9x8xf32> to vector<8x8xf32>
    %c0_101 = arith.constant 0 : index
    %c4_102 = arith.constant 4 : index
    %236 = memref.load %arg2[%c0_101, %c4_102] : memref<3x36xf32, #tpu.memory_space<smem>>
    %237 = vector.broadcast %236 : f32 to vector<8x8xf32>
    %238 = arith.mulf %237, %235 : vector<8x8xf32>
    %239 = arith.addf %222, %238 : vector<8x8xf32>
    %c1_103 = arith.constant 1 : index
    %c4_104 = arith.constant 4 : index
    %240 = memref.load %arg2[%c1_103, %c4_104] : memref<3x36xf32, #tpu.memory_space<smem>>
    %241 = vector.broadcast %240 : f32 to vector<8x8xf32>
    %242 = arith.mulf %241, %235 : vector<8x8xf32>
    %243 = arith.addf %226, %242 : vector<8x8xf32>
    %c2_105 = arith.constant 2 : index
    %c4_106 = arith.constant 4 : index
    %244 = memref.load %arg2[%c2_105, %c4_106] : memref<3x36xf32, #tpu.memory_space<smem>>
    %245 = vector.broadcast %244 : f32 to vector<8x8xf32>
    %246 = arith.mulf %245, %235 : vector<8x8xf32>
    %247 = arith.addf %230, %246 : vector<8x8xf32>
    %248 = vector.extract_strided_slice %234 {offsets = [1, 0], sizes = [8, 8], strides = [1, 1]} : vector<9x8xf32> to vector<8x8xf32>
    %c0_107 = arith.constant 0 : index
    %c28 = arith.constant 28 : index
    %249 = memref.load %arg2[%c0_107, %c28] : memref<3x36xf32, #tpu.memory_space<smem>>
    %250 = vector.broadcast %249 : f32 to vector<8x8xf32>
    %251 = arith.mulf %250, %248 : vector<8x8xf32>
    %252 = arith.addf %239, %251 : vector<8x8xf32>
    %c1_108 = arith.constant 1 : index
    %c28_109 = arith.constant 28 : index
    %253 = memref.load %arg2[%c1_108, %c28_109] : memref<3x36xf32, #tpu.memory_space<smem>>
    %254 = vector.broadcast %253 : f32 to vector<8x8xf32>
    %255 = arith.mulf %254, %248 : vector<8x8xf32>
    %256 = arith.addf %243, %255 : vector<8x8xf32>
    %c2_110 = arith.constant 2 : index
    %c28_111 = arith.constant 28 : index
    %257 = memref.load %arg2[%c2_110, %c28_111] : memref<3x36xf32, #tpu.memory_space<smem>>
    %258 = vector.broadcast %257 : f32 to vector<8x8xf32>
    %259 = arith.mulf %258, %248 : vector<8x8xf32>
    %260 = arith.addf %247, %259 : vector<8x8xf32>
    %c0_112 = arith.constant 0 : index
    %c5 = arith.constant 5 : index
    %c0_113 = arith.constant 0 : index
    %c0_114 = arith.constant 0 : index
    %261 = vector.load %arg1[%c0_112, %c5, %c0_113, %c0_114] : memref<1x16x9x9xbf16, #tpu.memory_space<vmem>>, vector<1x1x9x9xbf16>
    %262 = vector.shape_cast %261 : vector<1x1x9x9xbf16> to vector<9x9xbf16>
    %263 = arith.extf %262 : vector<9x9xbf16> to vector<9x9xf32>
    %264 = vector.extract_strided_slice %263 {offsets = [0, 0], sizes = [9, 8], strides = [1, 1]} : vector<9x9xf32> to vector<9x8xf32>
    %265 = vector.extract_strided_slice %264 {offsets = [0, 0], sizes = [8, 8], strides = [1, 1]} : vector<9x8xf32> to vector<8x8xf32>
    %c0_115 = arith.constant 0 : index
    %c5_116 = arith.constant 5 : index
    %266 = memref.load %arg2[%c0_115, %c5_116] : memref<3x36xf32, #tpu.memory_space<smem>>
    %267 = vector.broadcast %266 : f32 to vector<8x8xf32>
    %268 = arith.mulf %267, %265 : vector<8x8xf32>
    %269 = arith.addf %252, %268 : vector<8x8xf32>
    %c1_117 = arith.constant 1 : index
    %c5_118 = arith.constant 5 : index
    %270 = memref.load %arg2[%c1_117, %c5_118] : memref<3x36xf32, #tpu.memory_space<smem>>
    %271 = vector.broadcast %270 : f32 to vector<8x8xf32>
    %272 = arith.mulf %271, %265 : vector<8x8xf32>
    %273 = arith.addf %256, %272 : vector<8x8xf32>
    %c2_119 = arith.constant 2 : index
    %c5_120 = arith.constant 5 : index
    %274 = memref.load %arg2[%c2_119, %c5_120] : memref<3x36xf32, #tpu.memory_space<smem>>
    %275 = vector.broadcast %274 : f32 to vector<8x8xf32>
    %276 = arith.mulf %275, %265 : vector<8x8xf32>
    %277 = arith.addf %260, %276 : vector<8x8xf32>
    %278 = vector.extract_strided_slice %264 {offsets = [1, 0], sizes = [8, 8], strides = [1, 1]} : vector<9x8xf32> to vector<8x8xf32>
    %c0_121 = arith.constant 0 : index
    %c29 = arith.constant 29 : index
    %279 = memref.load %arg2[%c0_121, %c29] : memref<3x36xf32, #tpu.memory_space<smem>>
    %280 = vector.broadcast %279 : f32 to vector<8x8xf32>
    %281 = arith.mulf %280, %278 : vector<8x8xf32>
    %282 = arith.addf %269, %281 : vector<8x8xf32>
    %c1_122 = arith.constant 1 : index
    %c29_123 = arith.constant 29 : index
    %283 = memref.load %arg2[%c1_122, %c29_123] : memref<3x36xf32, #tpu.memory_space<smem>>
    %284 = vector.broadcast %283 : f32 to vector<8x8xf32>
    %285 = arith.mulf %284, %278 : vector<8x8xf32>
    %286 = arith.addf %273, %285 : vector<8x8xf32>
    %c2_124 = arith.constant 2 : index
    %c29_125 = arith.constant 29 : index
    %287 = memref.load %arg2[%c2_124, %c29_125] : memref<3x36xf32, #tpu.memory_space<smem>>
    %288 = vector.broadcast %287 : f32 to vector<8x8xf32>
    %289 = arith.mulf %288, %278 : vector<8x8xf32>
    %290 = arith.addf %277, %289 : vector<8x8xf32>
    %c0_126 = arith.constant 0 : index
    %c6 = arith.constant 6 : index
    %c0_127 = arith.constant 0 : index
    %c0_128 = arith.constant 0 : index
    %291 = vector.load %arg1[%c0_126, %c6, %c0_127, %c0_128] : memref<1x16x9x9xbf16, #tpu.memory_space<vmem>>, vector<1x1x9x9xbf16>
    %292 = vector.shape_cast %291 : vector<1x1x9x9xbf16> to vector<9x9xbf16>
    %293 = arith.extf %292 : vector<9x9xbf16> to vector<9x9xf32>
    %294 = vector.extract_strided_slice %293 {offsets = [0, 0], sizes = [9, 8], strides = [1, 1]} : vector<9x9xf32> to vector<9x8xf32>
    %295 = vector.extract_strided_slice %294 {offsets = [0, 0], sizes = [8, 8], strides = [1, 1]} : vector<9x8xf32> to vector<8x8xf32>
    %c0_129 = arith.constant 0 : index
    %c6_130 = arith.constant 6 : index
    %296 = memref.load %arg2[%c0_129, %c6_130] : memref<3x36xf32, #tpu.memory_space<smem>>
    %297 = vector.broadcast %296 : f32 to vector<8x8xf32>
    %298 = arith.mulf %297, %295 : vector<8x8xf32>
    %299 = arith.addf %282, %298 : vector<8x8xf32>
    %c1_131 = arith.constant 1 : index
    %c6_132 = arith.constant 6 : index
    %300 = memref.load %arg2[%c1_131, %c6_132] : memref<3x36xf32, #tpu.memory_space<smem>>
    %301 = vector.broadcast %300 : f32 to vector<8x8xf32>
    %302 = arith.mulf %301, %295 : vector<8x8xf32>
    %303 = arith.addf %286, %302 : vector<8x8xf32>
    %c2_133 = arith.constant 2 : index
    %c6_134 = arith.constant 6 : index
    %304 = memref.load %arg2[%c2_133, %c6_134] : memref<3x36xf32, #tpu.memory_space<smem>>
    %305 = vector.broadcast %304 : f32 to vector<8x8xf32>
    %306 = arith.mulf %305, %295 : vector<8x8xf32>
    %307 = arith.addf %290, %306 : vector<8x8xf32>
    %308 = vector.extract_strided_slice %294 {offsets = [1, 0], sizes = [8, 8], strides = [1, 1]} : vector<9x8xf32> to vector<8x8xf32>
    %c0_135 = arith.constant 0 : index
    %c30 = arith.constant 30 : index
    %309 = memref.load %arg2[%c0_135, %c30] : memref<3x36xf32, #tpu.memory_space<smem>>
    %310 = vector.broadcast %309 : f32 to vector<8x8xf32>
    %311 = arith.mulf %310, %308 : vector<8x8xf32>
    %312 = arith.addf %299, %311 : vector<8x8xf32>
    %c1_136 = arith.constant 1 : index
    %c30_137 = arith.constant 30 : index
    %313 = memref.load %arg2[%c1_136, %c30_137] : memref<3x36xf32, #tpu.memory_space<smem>>
    %314 = vector.broadcast %313 : f32 to vector<8x8xf32>
    %315 = arith.mulf %314, %308 : vector<8x8xf32>
    %316 = arith.addf %303, %315 : vector<8x8xf32>
    %c2_138 = arith.constant 2 : index
    %c30_139 = arith.constant 30 : index
    %317 = memref.load %arg2[%c2_138, %c30_139] : memref<3x36xf32, #tpu.memory_space<smem>>
    %318 = vector.broadcast %317 : f32 to vector<8x8xf32>
    %319 = arith.mulf %318, %308 : vector<8x8xf32>
    %320 = arith.addf %307, %319 : vector<8x8xf32>
    %c0_140 = arith.constant 0 : index
    %c7 = arith.constant 7 : index
    %c0_141 = arith.constant 0 : index
    %c0_142 = arith.constant 0 : index
    %321 = vector.load %arg1[%c0_140, %c7, %c0_141, %c0_142] : memref<1x16x9x9xbf16, #tpu.memory_space<vmem>>, vector<1x1x9x9xbf16>
    %322 = vector.shape_cast %321 : vector<1x1x9x9xbf16> to vector<9x9xbf16>
    %323 = arith.extf %322 : vector<9x9xbf16> to vector<9x9xf32>
    %324 = vector.extract_strided_slice %323 {offsets = [0, 0], sizes = [9, 8], strides = [1, 1]} : vector<9x9xf32> to vector<9x8xf32>
    %325 = vector.extract_strided_slice %324 {offsets = [0, 0], sizes = [8, 8], strides = [1, 1]} : vector<9x8xf32> to vector<8x8xf32>
    %c0_143 = arith.constant 0 : index
    %c7_144 = arith.constant 7 : index
    %326 = memref.load %arg2[%c0_143, %c7_144] : memref<3x36xf32, #tpu.memory_space<smem>>
    %327 = vector.broadcast %326 : f32 to vector<8x8xf32>
    %328 = arith.mulf %327, %325 : vector<8x8xf32>
    %329 = arith.addf %312, %328 : vector<8x8xf32>
    %c1_145 = arith.constant 1 : index
    %c7_146 = arith.constant 7 : index
    %330 = memref.load %arg2[%c1_145, %c7_146] : memref<3x36xf32, #tpu.memory_space<smem>>
    %331 = vector.broadcast %330 : f32 to vector<8x8xf32>
    %332 = arith.mulf %331, %325 : vector<8x8xf32>
    %333 = arith.addf %316, %332 : vector<8x8xf32>
    %c2_147 = arith.constant 2 : index
    %c7_148 = arith.constant 7 : index
    %334 = memref.load %arg2[%c2_147, %c7_148] : memref<3x36xf32, #tpu.memory_space<smem>>
    %335 = vector.broadcast %334 : f32 to vector<8x8xf32>
    %336 = arith.mulf %335, %325 : vector<8x8xf32>
    %337 = arith.addf %320, %336 : vector<8x8xf32>
    %338 = vector.extract_strided_slice %324 {offsets = [1, 0], sizes = [8, 8], strides = [1, 1]} : vector<9x8xf32> to vector<8x8xf32>
    %c0_149 = arith.constant 0 : index
    %c31 = arith.constant 31 : index
    %339 = memref.load %arg2[%c0_149, %c31] : memref<3x36xf32, #tpu.memory_space<smem>>
    %340 = vector.broadcast %339 : f32 to vector<8x8xf32>
    %341 = arith.mulf %340, %338 : vector<8x8xf32>
    %342 = arith.addf %329, %341 : vector<8x8xf32>
    %c1_150 = arith.constant 1 : index
    %c31_151 = arith.constant 31 : index
    %343 = memref.load %arg2[%c1_150, %c31_151] : memref<3x36xf32, #tpu.memory_space<smem>>
    %344 = vector.broadcast %343 : f32 to vector<8x8xf32>
    %345 = arith.mulf %344, %338 : vector<8x8xf32>
    %346 = arith.addf %333, %345 : vector<8x8xf32>
    %c2_152 = arith.constant 2 : index
    %c31_153 = arith.constant 31 : index
    %347 = memref.load %arg2[%c2_152, %c31_153] : memref<3x36xf32, #tpu.memory_space<smem>>
    %348 = vector.broadcast %347 : f32 to vector<8x8xf32>
    %349 = arith.mulf %348, %338 : vector<8x8xf32>
    %350 = arith.addf %337, %349 : vector<8x8xf32>
    %c0_154 = arith.constant 0 : index
    %c8_155 = arith.constant 8 : index
    %c0_156 = arith.constant 0 : index
    %c0_157 = arith.constant 0 : index
    %351 = vector.load %arg1[%c0_154, %c8_155, %c0_156, %c0_157] : memref<1x16x9x9xbf16, #tpu.memory_space<vmem>>, vector<1x1x9x9xbf16>
    %352 = vector.shape_cast %351 : vector<1x1x9x9xbf16> to vector<9x9xbf16>
    %353 = arith.extf %352 : vector<9x9xbf16> to vector<9x9xf32>
    %354 = vector.extract_strided_slice %353 {offsets = [0, 0], sizes = [9, 8], strides = [1, 1]} : vector<9x9xf32> to vector<9x8xf32>
    %355 = vector.extract_strided_slice %353 {offsets = [0, 1], sizes = [9, 8], strides = [1, 1]} : vector<9x9xf32> to vector<9x8xf32>
    %356 = vector.extract_strided_slice %354 {offsets = [0, 0], sizes = [8, 8], strides = [1, 1]} : vector<9x8xf32> to vector<8x8xf32>
    %c0_158 = arith.constant 0 : index
    %c12 = arith.constant 12 : index
    %357 = memref.load %arg2[%c0_158, %c12] : memref<3x36xf32, #tpu.memory_space<smem>>
    %358 = vector.broadcast %357 : f32 to vector<8x8xf32>
    %359 = arith.mulf %358, %356 : vector<8x8xf32>
    %360 = arith.addf %342, %359 : vector<8x8xf32>
    %c1_159 = arith.constant 1 : index
    %c12_160 = arith.constant 12 : index
    %361 = memref.load %arg2[%c1_159, %c12_160] : memref<3x36xf32, #tpu.memory_space<smem>>
    %362 = vector.broadcast %361 : f32 to vector<8x8xf32>
    %363 = arith.mulf %362, %356 : vector<8x8xf32>
    %364 = arith.addf %346, %363 : vector<8x8xf32>
    %c2_161 = arith.constant 2 : index
    %c12_162 = arith.constant 12 : index
    %365 = memref.load %arg2[%c2_161, %c12_162] : memref<3x36xf32, #tpu.memory_space<smem>>
    %366 = vector.broadcast %365 : f32 to vector<8x8xf32>
    %367 = arith.mulf %366, %356 : vector<8x8xf32>
    %368 = arith.addf %350, %367 : vector<8x8xf32>
    %369 = vector.extract_strided_slice %355 {offsets = [0, 0], sizes = [8, 8], strides = [1, 1]} : vector<9x8xf32> to vector<8x8xf32>
    %c0_163 = arith.constant 0 : index
    %c20 = arith.constant 20 : index
    %370 = memref.load %arg2[%c0_163, %c20] : memref<3x36xf32, #tpu.memory_space<smem>>
    %371 = vector.broadcast %370 : f32 to vector<8x8xf32>
    %372 = arith.mulf %371, %369 : vector<8x8xf32>
    %373 = arith.addf %360, %372 : vector<8x8xf32>
    %c1_164 = arith.constant 1 : index
    %c20_165 = arith.constant 20 : index
    %374 = memref.load %arg2[%c1_164, %c20_165] : memref<3x36xf32, #tpu.memory_space<smem>>
    %375 = vector.broadcast %374 : f32 to vector<8x8xf32>
    %376 = arith.mulf %375, %369 : vector<8x8xf32>
    %377 = arith.addf %364, %376 : vector<8x8xf32>
    %c2_166 = arith.constant 2 : index
    %c20_167 = arith.constant 20 : index
    %378 = memref.load %arg2[%c2_166, %c20_167] : memref<3x36xf32, #tpu.memory_space<smem>>
    %379 = vector.broadcast %378 : f32 to vector<8x8xf32>
    %380 = arith.mulf %379, %369 : vector<8x8xf32>
    %381 = arith.addf %368, %380 : vector<8x8xf32>
    %c0_168 = arith.constant 0 : index
    %c9_169 = arith.constant 9 : index
    %c0_170 = arith.constant 0 : index
    %c0_171 = arith.constant 0 : index
    %382 = vector.load %arg1[%c0_168, %c9_169, %c0_170, %c0_171] : memref<1x16x9x9xbf16, #tpu.memory_space<vmem>>, vector<1x1x9x9xbf16>
    %383 = vector.shape_cast %382 : vector<1x1x9x9xbf16> to vector<9x9xbf16>
    %384 = arith.extf %383 : vector<9x9xbf16> to vector<9x9xf32>
    %385 = vector.extract_strided_slice %384 {offsets = [0, 0], sizes = [9, 8], strides = [1, 1]} : vector<9x9xf32> to vector<9x8xf32>
    %386 = vector.extract_strided_slice %384 {offsets = [0, 1], sizes = [9, 8], strides = [1, 1]} : vector<9x9xf32> to vector<9x8xf32>
    %387 = vector.extract_strided_slice %385 {offsets = [0, 0], sizes = [8, 8], strides = [1, 1]} : vector<9x8xf32> to vector<8x8xf32>
    %c0_172 = arith.constant 0 : index
    %c13 = arith.constant 13 : index
    %388 = memref.load %arg2[%c0_172, %c13] : memref<3x36xf32, #tpu.memory_space<smem>>
    %389 = vector.broadcast %388 : f32 to vector<8x8xf32>
    %390 = arith.mulf %389, %387 : vector<8x8xf32>
    %391 = arith.addf %373, %390 : vector<8x8xf32>
    %c1_173 = arith.constant 1 : index
    %c13_174 = arith.constant 13 : index
    %392 = memref.load %arg2[%c1_173, %c13_174] : memref<3x36xf32, #tpu.memory_space<smem>>
    %393 = vector.broadcast %392 : f32 to vector<8x8xf32>
    %394 = arith.mulf %393, %387 : vector<8x8xf32>
    %395 = arith.addf %377, %394 : vector<8x8xf32>
    %c2_175 = arith.constant 2 : index
    %c13_176 = arith.constant 13 : index
    %396 = memref.load %arg2[%c2_175, %c13_176] : memref<3x36xf32, #tpu.memory_space<smem>>
    %397 = vector.broadcast %396 : f32 to vector<8x8xf32>
    %398 = arith.mulf %397, %387 : vector<8x8xf32>
    %399 = arith.addf %381, %398 : vector<8x8xf32>
    %400 = vector.extract_strided_slice %386 {offsets = [0, 0], sizes = [8, 8], strides = [1, 1]} : vector<9x8xf32> to vector<8x8xf32>
    %c0_177 = arith.constant 0 : index
    %c21 = arith.constant 21 : index
    %401 = memref.load %arg2[%c0_177, %c21] : memref<3x36xf32, #tpu.memory_space<smem>>
    %402 = vector.broadcast %401 : f32 to vector<8x8xf32>
    %403 = arith.mulf %402, %400 : vector<8x8xf32>
    %404 = arith.addf %391, %403 : vector<8x8xf32>
    %c1_178 = arith.constant 1 : index
    %c21_179 = arith.constant 21 : index
    %405 = memref.load %arg2[%c1_178, %c21_179] : memref<3x36xf32, #tpu.memory_space<smem>>
    %406 = vector.broadcast %405 : f32 to vector<8x8xf32>
    %407 = arith.mulf %406, %400 : vector<8x8xf32>
    %408 = arith.addf %395, %407 : vector<8x8xf32>
    %c2_180 = arith.constant 2 : index
    %c21_181 = arith.constant 21 : index
    %409 = memref.load %arg2[%c2_180, %c21_181] : memref<3x36xf32, #tpu.memory_space<smem>>
    %410 = vector.broadcast %409 : f32 to vector<8x8xf32>
    %411 = arith.mulf %410, %400 : vector<8x8xf32>
    %412 = arith.addf %399, %411 : vector<8x8xf32>
    %c0_182 = arith.constant 0 : index
    %c10_183 = arith.constant 10 : index
    %c0_184 = arith.constant 0 : index
    %c0_185 = arith.constant 0 : index
    %413 = vector.load %arg1[%c0_182, %c10_183, %c0_184, %c0_185] : memref<1x16x9x9xbf16, #tpu.memory_space<vmem>>, vector<1x1x9x9xbf16>
    %414 = vector.shape_cast %413 : vector<1x1x9x9xbf16> to vector<9x9xbf16>
    %415 = arith.extf %414 : vector<9x9xbf16> to vector<9x9xf32>
    %416 = vector.extract_strided_slice %415 {offsets = [0, 0], sizes = [9, 8], strides = [1, 1]} : vector<9x9xf32> to vector<9x8xf32>
    %417 = vector.extract_strided_slice %415 {offsets = [0, 1], sizes = [9, 8], strides = [1, 1]} : vector<9x9xf32> to vector<9x8xf32>
    %418 = vector.extract_strided_slice %416 {offsets = [0, 0], sizes = [8, 8], strides = [1, 1]} : vector<9x8xf32> to vector<8x8xf32>
    %c0_186 = arith.constant 0 : index
    %c14 = arith.constant 14 : index
    %419 = memref.load %arg2[%c0_186, %c14] : memref<3x36xf32, #tpu.memory_space<smem>>
    %420 = vector.broadcast %419 : f32 to vector<8x8xf32>
    %421 = arith.mulf %420, %418 : vector<8x8xf32>
    %422 = arith.addf %404, %421 : vector<8x8xf32>
    %c1_187 = arith.constant 1 : index
    %c14_188 = arith.constant 14 : index
    %423 = memref.load %arg2[%c1_187, %c14_188] : memref<3x36xf32, #tpu.memory_space<smem>>
    %424 = vector.broadcast %423 : f32 to vector<8x8xf32>
    %425 = arith.mulf %424, %418 : vector<8x8xf32>
    %426 = arith.addf %408, %425 : vector<8x8xf32>
    %c2_189 = arith.constant 2 : index
    %c14_190 = arith.constant 14 : index
    %427 = memref.load %arg2[%c2_189, %c14_190] : memref<3x36xf32, #tpu.memory_space<smem>>
    %428 = vector.broadcast %427 : f32 to vector<8x8xf32>
    %429 = arith.mulf %428, %418 : vector<8x8xf32>
    %430 = arith.addf %412, %429 : vector<8x8xf32>
    %431 = vector.extract_strided_slice %417 {offsets = [0, 0], sizes = [8, 8], strides = [1, 1]} : vector<9x8xf32> to vector<8x8xf32>
    %c0_191 = arith.constant 0 : index
    %c22 = arith.constant 22 : index
    %432 = memref.load %arg2[%c0_191, %c22] : memref<3x36xf32, #tpu.memory_space<smem>>
    %433 = vector.broadcast %432 : f32 to vector<8x8xf32>
    %434 = arith.mulf %433, %431 : vector<8x8xf32>
    %435 = arith.addf %422, %434 : vector<8x8xf32>
    %c1_192 = arith.constant 1 : index
    %c22_193 = arith.constant 22 : index
    %436 = memref.load %arg2[%c1_192, %c22_193] : memref<3x36xf32, #tpu.memory_space<smem>>
    %437 = vector.broadcast %436 : f32 to vector<8x8xf32>
    %438 = arith.mulf %437, %431 : vector<8x8xf32>
    %439 = arith.addf %426, %438 : vector<8x8xf32>
    %c2_194 = arith.constant 2 : index
    %c22_195 = arith.constant 22 : index
    %440 = memref.load %arg2[%c2_194, %c22_195] : memref<3x36xf32, #tpu.memory_space<smem>>
    %441 = vector.broadcast %440 : f32 to vector<8x8xf32>
    %442 = arith.mulf %441, %431 : vector<8x8xf32>
    %443 = arith.addf %430, %442 : vector<8x8xf32>
    %c0_196 = arith.constant 0 : index
    %c11_197 = arith.constant 11 : index
    %c0_198 = arith.constant 0 : index
    %c0_199 = arith.constant 0 : index
    %444 = vector.load %arg1[%c0_196, %c11_197, %c0_198, %c0_199] : memref<1x16x9x9xbf16, #tpu.memory_space<vmem>>, vector<1x1x9x9xbf16>
    %445 = vector.shape_cast %444 : vector<1x1x9x9xbf16> to vector<9x9xbf16>
    %446 = arith.extf %445 : vector<9x9xbf16> to vector<9x9xf32>
    %447 = vector.extract_strided_slice %446 {offsets = [0, 0], sizes = [9, 8], strides = [1, 1]} : vector<9x9xf32> to vector<9x8xf32>
    %448 = vector.extract_strided_slice %446 {offsets = [0, 1], sizes = [9, 8], strides = [1, 1]} : vector<9x9xf32> to vector<9x8xf32>
    %449 = vector.extract_strided_slice %447 {offsets = [0, 0], sizes = [8, 8], strides = [1, 1]} : vector<9x8xf32> to vector<8x8xf32>
    %c0_200 = arith.constant 0 : index
    %c15 = arith.constant 15 : index
    %450 = memref.load %arg2[%c0_200, %c15] : memref<3x36xf32, #tpu.memory_space<smem>>
    %451 = vector.broadcast %450 : f32 to vector<8x8xf32>
    %452 = arith.mulf %451, %449 : vector<8x8xf32>
    %453 = arith.addf %435, %452 : vector<8x8xf32>
    %c1_201 = arith.constant 1 : index
    %c15_202 = arith.constant 15 : index
    %454 = memref.load %arg2[%c1_201, %c15_202] : memref<3x36xf32, #tpu.memory_space<smem>>
    %455 = vector.broadcast %454 : f32 to vector<8x8xf32>
    %456 = arith.mulf %455, %449 : vector<8x8xf32>
    %457 = arith.addf %439, %456 : vector<8x8xf32>
    %c2_203 = arith.constant 2 : index
    %c15_204 = arith.constant 15 : index
    %458 = memref.load %arg2[%c2_203, %c15_204] : memref<3x36xf32, #tpu.memory_space<smem>>
    %459 = vector.broadcast %458 : f32 to vector<8x8xf32>
    %460 = arith.mulf %459, %449 : vector<8x8xf32>
    %461 = arith.addf %443, %460 : vector<8x8xf32>
    %462 = vector.extract_strided_slice %448 {offsets = [0, 0], sizes = [8, 8], strides = [1, 1]} : vector<9x8xf32> to vector<8x8xf32>
    %c0_205 = arith.constant 0 : index
    %c23 = arith.constant 23 : index
    %463 = memref.load %arg2[%c0_205, %c23] : memref<3x36xf32, #tpu.memory_space<smem>>
    %464 = vector.broadcast %463 : f32 to vector<8x8xf32>
    %465 = arith.mulf %464, %462 : vector<8x8xf32>
    %466 = arith.addf %453, %465 : vector<8x8xf32>
    %c1_206 = arith.constant 1 : index
    %c23_207 = arith.constant 23 : index
    %467 = memref.load %arg2[%c1_206, %c23_207] : memref<3x36xf32, #tpu.memory_space<smem>>
    %468 = vector.broadcast %467 : f32 to vector<8x8xf32>
    %469 = arith.mulf %468, %462 : vector<8x8xf32>
    %470 = arith.addf %457, %469 : vector<8x8xf32>
    %c2_208 = arith.constant 2 : index
    %c23_209 = arith.constant 23 : index
    %471 = memref.load %arg2[%c2_208, %c23_209] : memref<3x36xf32, #tpu.memory_space<smem>>
    %472 = vector.broadcast %471 : f32 to vector<8x8xf32>
    %473 = arith.mulf %472, %462 : vector<8x8xf32>
    %474 = arith.addf %461, %473 : vector<8x8xf32>
    %c0_210 = arith.constant 0 : index
    %c12_211 = arith.constant 12 : index
    %c0_212 = arith.constant 0 : index
    %c0_213 = arith.constant 0 : index
    %475 = vector.load %arg1[%c0_210, %c12_211, %c0_212, %c0_213] : memref<1x16x9x9xbf16, #tpu.memory_space<vmem>>, vector<1x1x9x9xbf16>
    %476 = vector.shape_cast %475 : vector<1x1x9x9xbf16> to vector<9x9xbf16>
    %477 = arith.extf %476 : vector<9x9xbf16> to vector<9x9xf32>
    %478 = vector.extract_strided_slice %477 {offsets = [0, 0], sizes = [9, 8], strides = [1, 1]} : vector<9x9xf32> to vector<9x8xf32>
    %479 = vector.extract_strided_slice %478 {offsets = [0, 0], sizes = [8, 8], strides = [1, 1]} : vector<9x8xf32> to vector<8x8xf32>
    %c0_214 = arith.constant 0 : index
    %c16 = arith.constant 16 : index
    %480 = memref.load %arg2[%c0_214, %c16] : memref<3x36xf32, #tpu.memory_space<smem>>
    %481 = vector.broadcast %480 : f32 to vector<8x8xf32>
    %482 = arith.mulf %481, %479 : vector<8x8xf32>
    %483 = arith.addf %466, %482 : vector<8x8xf32>
    %c1_215 = arith.constant 1 : index
    %c16_216 = arith.constant 16 : index
    %484 = memref.load %arg2[%c1_215, %c16_216] : memref<3x36xf32, #tpu.memory_space<smem>>
    %485 = vector.broadcast %484 : f32 to vector<8x8xf32>
    %486 = arith.mulf %485, %479 : vector<8x8xf32>
    %487 = arith.addf %470, %486 : vector<8x8xf32>
    %c2_217 = arith.constant 2 : index
    %c16_218 = arith.constant 16 : index
    %488 = memref.load %arg2[%c2_217, %c16_218] : memref<3x36xf32, #tpu.memory_space<smem>>
    %489 = vector.broadcast %488 : f32 to vector<8x8xf32>
    %490 = arith.mulf %489, %479 : vector<8x8xf32>
    %491 = arith.addf %474, %490 : vector<8x8xf32>
    %c0_219 = arith.constant 0 : index
    %c13_220 = arith.constant 13 : index
    %c0_221 = arith.constant 0 : index
    %c0_222 = arith.constant 0 : index
    %492 = vector.load %arg1[%c0_219, %c13_220, %c0_221, %c0_222] : memref<1x16x9x9xbf16, #tpu.memory_space<vmem>>, vector<1x1x9x9xbf16>
    %493 = vector.shape_cast %492 : vector<1x1x9x9xbf16> to vector<9x9xbf16>
    %494 = arith.extf %493 : vector<9x9xbf16> to vector<9x9xf32>
    %495 = vector.extract_strided_slice %494 {offsets = [0, 0], sizes = [9, 8], strides = [1, 1]} : vector<9x9xf32> to vector<9x8xf32>
    %496 = vector.extract_strided_slice %495 {offsets = [0, 0], sizes = [8, 8], strides = [1, 1]} : vector<9x8xf32> to vector<8x8xf32>
    %c0_223 = arith.constant 0 : index
    %c17 = arith.constant 17 : index
    %497 = memref.load %arg2[%c0_223, %c17] : memref<3x36xf32, #tpu.memory_space<smem>>
    %498 = vector.broadcast %497 : f32 to vector<8x8xf32>
    %499 = arith.mulf %498, %496 : vector<8x8xf32>
    %500 = arith.addf %483, %499 : vector<8x8xf32>
    %c1_224 = arith.constant 1 : index
    %c17_225 = arith.constant 17 : index
    %501 = memref.load %arg2[%c1_224, %c17_225] : memref<3x36xf32, #tpu.memory_space<smem>>
    %502 = vector.broadcast %501 : f32 to vector<8x8xf32>
    %503 = arith.mulf %502, %496 : vector<8x8xf32>
    %504 = arith.addf %487, %503 : vector<8x8xf32>
    %c2_226 = arith.constant 2 : index
    %c17_227 = arith.constant 17 : index
    %505 = memref.load %arg2[%c2_226, %c17_227] : memref<3x36xf32, #tpu.memory_space<smem>>
    %506 = vector.broadcast %505 : f32 to vector<8x8xf32>
    %507 = arith.mulf %506, %496 : vector<8x8xf32>
    %508 = arith.addf %491, %507 : vector<8x8xf32>
    %c0_228 = arith.constant 0 : index
    %c14_229 = arith.constant 14 : index
    %c0_230 = arith.constant 0 : index
    %c0_231 = arith.constant 0 : index
    %509 = vector.load %arg1[%c0_228, %c14_229, %c0_230, %c0_231] : memref<1x16x9x9xbf16, #tpu.memory_space<vmem>>, vector<1x1x9x9xbf16>
    %510 = vector.shape_cast %509 : vector<1x1x9x9xbf16> to vector<9x9xbf16>
    %511 = arith.extf %510 : vector<9x9xbf16> to vector<9x9xf32>
    %512 = vector.extract_strided_slice %511 {offsets = [0, 0], sizes = [9, 8], strides = [1, 1]} : vector<9x9xf32> to vector<9x8xf32>
    %513 = vector.extract_strided_slice %512 {offsets = [0, 0], sizes = [8, 8], strides = [1, 1]} : vector<9x8xf32> to vector<8x8xf32>
    %c0_232 = arith.constant 0 : index
    %c18 = arith.constant 18 : index
    %514 = memref.load %arg2[%c0_232, %c18] : memref<3x36xf32, #tpu.memory_space<smem>>
    %515 = vector.broadcast %514 : f32 to vector<8x8xf32>
    %516 = arith.mulf %515, %513 : vector<8x8xf32>
    %517 = arith.addf %500, %516 : vector<8x8xf32>
    %c1_233 = arith.constant 1 : index
    %c18_234 = arith.constant 18 : index
    %518 = memref.load %arg2[%c1_233, %c18_234] : memref<3x36xf32, #tpu.memory_space<smem>>
    %519 = vector.broadcast %518 : f32 to vector<8x8xf32>
    %520 = arith.mulf %519, %513 : vector<8x8xf32>
    %521 = arith.addf %504, %520 : vector<8x8xf32>
    %c2_235 = arith.constant 2 : index
    %c18_236 = arith.constant 18 : index
    %522 = memref.load %arg2[%c2_235, %c18_236] : memref<3x36xf32, #tpu.memory_space<smem>>
    %523 = vector.broadcast %522 : f32 to vector<8x8xf32>
    %524 = arith.mulf %523, %513 : vector<8x8xf32>
    %525 = arith.addf %508, %524 : vector<8x8xf32>
    %c0_237 = arith.constant 0 : index
    %c15_238 = arith.constant 15 : index
    %c0_239 = arith.constant 0 : index
    %c0_240 = arith.constant 0 : index
    %526 = vector.load %arg1[%c0_237, %c15_238, %c0_239, %c0_240] : memref<1x16x9x9xbf16, #tpu.memory_space<vmem>>, vector<1x1x9x9xbf16>
    %527 = vector.shape_cast %526 : vector<1x1x9x9xbf16> to vector<9x9xbf16>
    %528 = arith.extf %527 : vector<9x9xbf16> to vector<9x9xf32>
    %529 = vector.extract_strided_slice %528 {offsets = [0, 0], sizes = [9, 8], strides = [1, 1]} : vector<9x9xf32> to vector<9x8xf32>
    %530 = vector.extract_strided_slice %529 {offsets = [0, 0], sizes = [8, 8], strides = [1, 1]} : vector<9x8xf32> to vector<8x8xf32>
    %c0_241 = arith.constant 0 : index
    %c19 = arith.constant 19 : index
    %531 = memref.load %arg2[%c0_241, %c19] : memref<3x36xf32, #tpu.memory_space<smem>>
    %532 = vector.broadcast %531 : f32 to vector<8x8xf32>
    %533 = arith.mulf %532, %530 : vector<8x8xf32>
    %534 = arith.addf %517, %533 : vector<8x8xf32>
    %c1_242 = arith.constant 1 : index
    %c19_243 = arith.constant 19 : index
    %535 = memref.load %arg2[%c1_242, %c19_243] : memref<3x36xf32, #tpu.memory_space<smem>>
    %536 = vector.broadcast %535 : f32 to vector<8x8xf32>
    %537 = arith.mulf %536, %530 : vector<8x8xf32>
    %538 = arith.addf %521, %537 : vector<8x8xf32>
    %c2_244 = arith.constant 2 : index
    %c19_245 = arith.constant 19 : index
    %539 = memref.load %arg2[%c2_244, %c19_245] : memref<3x36xf32, #tpu.memory_space<smem>>
    %540 = vector.broadcast %539 : f32 to vector<8x8xf32>
    %541 = arith.mulf %540, %530 : vector<8x8xf32>
    %542 = arith.addf %525, %541 : vector<8x8xf32>
    %c0_246 = arith.constant 0 : index
    %543 = memref.load %arg3[%c0_246] : memref<3xf32, #tpu.memory_space<smem>>
    %544 = vector.broadcast %543 : f32 to vector<8x8xf32>
    %545 = arith.addf %534, %544 : vector<8x8xf32>
    %cst_247 = arith.constant 0.000000e+00 : f32
    %546 = vector.broadcast %cst_247 : f32 to vector<8x8xf32>
    %547 = arith.maximumf %545, %546 : vector<8x8xf32>
    %c1_248 = arith.constant 1 : index
    %548 = memref.load %arg3[%c1_248] : memref<3xf32, #tpu.memory_space<smem>>
    %549 = vector.broadcast %548 : f32 to vector<8x8xf32>
    %550 = arith.addf %538, %549 : vector<8x8xf32>
    %cst_249 = arith.constant 0.000000e+00 : f32
    %551 = vector.broadcast %cst_249 : f32 to vector<8x8xf32>
    %552 = arith.maximumf %550, %551 : vector<8x8xf32>
    %c2_250 = arith.constant 2 : index
    %553 = memref.load %arg3[%c2_250] : memref<3xf32, #tpu.memory_space<smem>>
    %554 = vector.broadcast %553 : f32 to vector<8x8xf32>
    %555 = arith.addf %542, %554 : vector<8x8xf32>
    %cst_251 = arith.constant 0.000000e+00 : f32
    %556 = vector.broadcast %cst_251 : f32 to vector<8x8xf32>
    %557 = arith.maximumf %555, %556 : vector<8x8xf32>
    %c0_252 = arith.constant 0 : index
    %c0_253 = arith.constant 0 : index
    %558 = vector.load %arg7[%c0_252, %c0_253] : memref<24x8xf32, #tpu.memory_space<vmem>>, vector<8x8xf32>
    tpu.vector_store %arg7[%c0_252, %c0_253], %547 {strides = array<i32>} : memref<24x8xf32, #tpu.memory_space<vmem>>, vector<8x8xf32>,
    %c8_254 = arith.constant 8 : index
    %c0_255 = arith.constant 0 : index
    %559 = vector.load %arg7[%c8_254, %c0_255] : memref<24x8xf32, #tpu.memory_space<vmem>>, vector<8x8xf32>
    tpu.vector_store %arg7[%c8_254, %c0_255], %552 {strides = array<i32>} : memref<24x8xf32, #tpu.memory_space<vmem>>, vector<8x8xf32>,
    %c16_256 = arith.constant 16 : index
    %c0_257 = arith.constant 0 : index
    %560 = vector.load %arg7[%c16_256, %c0_257] : memref<24x8xf32, #tpu.memory_space<vmem>>, vector<8x8xf32>
    tpu.vector_store %arg7[%c16_256, %c0_257], %557 {strides = array<i32>} : memref<24x8xf32, #tpu.memory_space<vmem>>, vector<8x8xf32>,
    %c0_258 = arith.constant 0 : index
    %c0_259 = arith.constant 0 : index
    %561 = vector.load %arg7[%c0_258, %c0_259] : memref<24x8xf32, #tpu.memory_space<vmem>>, vector<24x8xf32>
    %562 = arith.truncf %561 : vector<24x8xf32> to vector<24x8xbf16>
    %c0_260 = arith.constant 0 : index
    %c0_261 = arith.constant 0 : index
    %563 = vector.load %arg5[%c0_260, %c0_261] : memref<8x16xbf16, #tpu.memory_space<vmem>>, vector<8x16xbf16>
    %cst_262 = arith.constant dense<0.000000e+00> : vector<24x16xf32>
    %564 = tpu.matmul %562, %563, %cst_262 {dimension_numbers = #tpu.dot_dimension_numbers<[1], [0], [0], [1], [0, 0, 1, 1], [], []>} : vector<24x8xbf16>, vector<8x16xbf16>, vector<24x16xf32> -> vector<24x16xf32>
    %c0_263 = arith.constant 0 : index
    %c0_264 = arith.constant 0 : index
    %565 = vector.load %arg4[%c0_263, %c0_264] : memref<16x8xbf16, #tpu.memory_space<vmem>>, vector<16x8xbf16>
    %566 = vector.extract_strided_slice %564 {offsets = [0, 0], sizes = [8, 16], strides = [1, 1]} : vector<24x16xf32> to vector<8x16xf32>
    %567 = arith.truncf %566 : vector<8x16xf32> to vector<8x16xbf16>
    %cst_265 = arith.constant dense<0.000000e+00> : vector<16x16xf32>
    %568 = tpu.matmul %565, %567, %cst_265 {dimension_numbers = #tpu.dot_dimension_numbers<[1], [0], [0], [1], [0, 0, 1, 1], [], []>} : vector<16x8xbf16>, vector<8x16xbf16>, vector<16x16xf32> -> vector<16x16xf32>
    %c0_266 = arith.constant 0 : index
    %c0_267 = arith.constant 0 : index
    %c0_268 = arith.constant 0 : index
    %c0_269 = arith.constant 0 : index
    %569 = vector.load %arg6[%c0_266, %c0_267, %c0_268, %c0_269] : memref<1x3x16x16xf32, #tpu.memory_space<vmem>>, vector<1x1x16x16xf32>
    %570 = vector.shape_cast %569 : vector<1x1x16x16xf32> to vector<16x16xf32>
    %571 = vector.shape_cast %568 : vector<16x16xf32> to vector<1x1x16x16xf32>
    tpu.vector_store %arg6[%c0_266, %c0_267, %c0_268, %c0_269], %571 {strides = array<i32>} : memref<1x3x16x16xf32, #tpu.memory_space<vmem>>, vector<1x1x16x16xf32>,
    %572 = vector.extract_strided_slice %564 {offsets = [8, 0], sizes = [8, 16], strides = [1, 1]} : vector<24x16xf32> to vector<8x16xf32>
    %573 = arith.truncf %572 : vector<8x16xf32> to vector<8x16xbf16>
    %cst_270 = arith.constant dense<0.000000e+00> : vector<16x16xf32>
    %574 = tpu.matmul %565, %573, %cst_270 {dimension_numbers = #tpu.dot_dimension_numbers<[1], [0], [0], [1], [0, 0, 1, 1], [], []>} : vector<16x8xbf16>, vector<8x16xbf16>, vector<16x16xf32> -> vector<16x16xf32>
    %c0_271 = arith.constant 0 : index
    %c1_272 = arith.constant 1 : index
    %c0_273 = arith.constant 0 : index
    %c0_274 = arith.constant 0 : index
    %575 = vector.load %arg6[%c0_271, %c1_272, %c0_273, %c0_274] : memref<1x3x16x16xf32, #tpu.memory_space<vmem>>, vector<1x1x16x16xf32>
    %576 = vector.shape_cast %575 : vector<1x1x16x16xf32> to vector<16x16xf32>
    %577 = vector.shape_cast %574 : vector<16x16xf32> to vector<1x1x16x16xf32>
    tpu.vector_store %arg6[%c0_271, %c1_272, %c0_273, %c0_274], %577 {strides = array<i32>} : memref<1x3x16x16xf32, #tpu.memory_space<vmem>>, vector<1x1x16x16xf32>,
    %578 = vector.extract_strided_slice %564 {offsets = [16, 0], sizes = [8, 16], strides = [1, 1]} : vector<24x16xf32> to vector<8x16xf32>
    %579 = arith.truncf %578 : vector<8x16xf32> to vector<8x16xbf16>
    %cst_275 = arith.constant dense<0.000000e+00> : vector<16x16xf32>
    %580 = tpu.matmul %565, %579, %cst_275 {dimension_numbers = #tpu.dot_dimension_numbers<[1], [0], [0], [1], [0, 0, 1, 1], [], []>} : vector<16x8xbf16>, vector<8x16xbf16>, vector<16x16xf32> -> vector<16x16xf32>
    %c0_276 = arith.constant 0 : index
    %c2_277 = arith.constant 2 : index
    %c0_278 = arith.constant 0 : index
    %c0_279 = arith.constant 0 : index
    %581 = vector.load %arg6[%c0_276, %c2_277, %c0_278, %c0_279] : memref<1x3x16x16xf32, #tpu.memory_space<vmem>>, vector<1x1x16x16xf32>
    %582 = vector.shape_cast %581 : vector<1x1x16x16xf32> to vector<16x16xf32>
    %583 = vector.shape_cast %580 : vector<16x16xf32> to vector<1x1x16x16xf32>
    tpu.vector_store %arg6[%c0_276, %c2_277, %c0_278, %c0_279], %583 {strides = array<i32>} : memref<1x3x16x16xf32, #tpu.memory_space<vmem>>, vector<1x1x16x16xf32>,
    return
  }
  func.func @transform_0(%arg0: i32) -> (i32, i32, i32, i32) {
    %c0_i32 = arith.constant 0 : i32
    %c0_i32_0 = arith.constant 0 : i32
    %c0_i32_1 = arith.constant 0 : i32
    %c0_i32_2 = arith.constant 0 : i32
    return %arg0, %c0_i32, %c0_i32_0, %c0_i32_1 : i32, i32, i32, i32
  }
  func.func @transform_1(%arg0: i32) -> (i32, i32) {
    %c0_i32 = arith.constant 0 : i32
    %c0_i32_0 = arith.constant 0 : i32
    %c0_i32_1 = arith.constant 0 : i32
    return %c0_i32, %c0_i32_0 : i32, i32
  }
  func.func @transform_2(%arg0: i32) -> i32 {
    %c0_i32 = arith.constant 0 : i32
    %c0_i32_0 = arith.constant 0 : i32
    return %c0_i32 : i32
  }
  func.func @transform_3(%arg0: i32) -> (i32, i32) {
    %c0_i32 = arith.constant 0 : i32
    %c0_i32_0 = arith.constant 0 : i32
    %c0_i32_1 = arith.constant 0 : i32
    return %c0_i32, %c0_i32_0 : i32, i32
  }
  func.func @transform_4(%arg0: i32) -> (i32, i32) {
    %c0_i32 = arith.constant 0 : i32
    %c0_i32_0 = arith.constant 0 : i32
    %c0_i32_1 = arith.constant 0 : i32
    return %c0_i32, %c0_i32_0 : i32, i32
  }
  func.func @transform_5(%arg0: i32) -> (i32, i32, i32, i32) {
    %c0_i32 = arith.constant 0 : i32
    %c0_i32_0 = arith.constant 0 : i32
    %c0_i32_1 = arith.constant 0 : i32
    %c0_i32_2 = arith.constant 0 : i32
    return %arg0, %c0_i32, %c0_i32_0, %c0_i32_1 : i32, i32, i32, i32
  }
}

</mosaic_0001>

<bundles_post_ra>
// kernel: tpu_custom_call.1
= control target key start
LH: loop header
LB: loop body
LE: loop exit
PB: predicated region body
PF: predicated region fallthrough
CT: control target
= control target key end

     0   :  { %10 = vsyncpa [#allocation5], 0  ;;  %s2654_s0 = inlined_call_operand.vmem [shape: bf16[2,16,9,9], index: 0, kind: input, shape index: {}]   ;;  %s2655_s1 = inlined_call_operand.vmem [shape: f32[3,36], index: 1, kind: input, shape index: {}]   ;;  %s2656_s2 = inlined_call_operand.vmem [shape: f32[3], index: 2, kind: input, shape index: {}]   ;;  %s2657_s3 = inlined_call_operand.vmem [shape: bf16[16,8], index: 3, kind: input, shape index: {}]   ;;  %s2658_s4 = inlined_call_operand.vmem [shape: bf16[8,16], index: 4, kind: input, shape index: {}]   ;;  %s2659_s5 = inlined_call_operand.hbm [shape: f32[2,3,16,16], index: 5, kind: output, shape index: {}]  }
   0x1   :  { %11 = vsyncpa [#allocation7], 0 }
   0x2   :  { %12 = vsyncpa [#allocation4], 0 }
   0x3   :  { %14 = vsyncpa [#allocation4 + $0x1], 0  ;;  %s1846_s18 = smov 0   ;;  %s1848_s19 = smov 0  }
   0x4   :  { %s1850_s20 = smov 0   ;;  %s1852_s21 = smov 0  }
   0x5 LB: > { %s1867_s22 = sadd.s32 4294967295, %s1806_s21   ;;  %s1451_s23 = sadd.s32 4294967294, %s1806_s21   ;;  %s1806_s21 = sphi %s1852_s21, %s2677_s21   ;;  %s1802_s20 = sphi %s1850_s20, %s2676_s20   ;;  %s1798_s19 = sphi %s1848_s19, %s2675_s19   ;;  %s1794_s18 = sphi %s1846_s18, %s2674_s18  }
   0x6   : > { %s1871_s24 = sadd.s32 1, %s1806_s21   ;;  %s137_s25 = sadd.s32 1, %s1802_s20 }
   0x7   : > { %s134_s26 = ssub.s32 %s1806_s21, %s1871_s24  ;;  %p147_p0 = scmp.ne.s32.totalorder %s1802_s20, %s1798_s19 }
   0x8   : > { %p135_p1 = scmp.eq.s32.totalorder %s134_s26, 0  ;;  %p148_p2 = scmp.eq.s32.totalorder %s1867_s22, 1 }
   0x9   : > { %p153_p3 = scmp.ne.s32.totalorder %s1798_s19, %s1794_s18  ;;  %p154_p4 = scmp.eq.s32.totalorder %s1451_s23, 1 }
   0xa   : > { %s1882_s27 = scalar_select %p135_p1, %s1802_s20, %s137_s25  }
   0xb   : > { %p1884_p5 = por %p148_p2, %p147_p0  ;;  %p1888_p6 = por %p154_p4, %p153_p3 }
   0xc   : > { %p1452_p7 = scmp.ge.s32.totalorder %s1806_s21, 1  ;;  %p161_p8 = scmp.lt.s32.totalorder %s1806_s21, 3 }
   0xd   : > { %s2663_s28 = scalar_select %p1884_p5, 1, 0 }
   0xe   : > { %s2664_s29 = scalar_select %p1888_p6, 1, 0 }
   0xf   : > { %p2660_p9 = scmp.eq.s32.totalorder %s1867_s22, 0  ;;  %p1895_p10 = pnand %p1452_p7, %p161_p8 }
  0x10   : > { %s174_s8 = sshll.u32 %s2655_s1, 4  ;;  %s185_s11 = sshll.u32 %s2656_s2, 4  ;;  %s175_s8 = int_to_ptr.vmem [resolvable:$true] %s174_s8  ;;  %s186_s11 = int_to_ptr.vmem [resolvable:$true] %s185_s11 }
  0x11   : > { %s2665_s30 = scalar_select %p1895_p10, 1, 0 }
  0x12   : > { %p1652_p11 = pneg %p1895_p10  ;;  %s1708_s13 = scalar_lea.vmem %s175_s8, 64 }
  0x13   : > { %p1709_p13 = scmp.ne.s32.totalorder %s175_s8, %s1708_s13  ;;  %p1716_p3 = scmp.lt.s32.totalorder %s175_s8, %s175_s8 }
  0x14   : > { %p1909_p12 = pnand %p2660_p9, %p1652_p11  ;;  %p1717_p4 = scmp.lt.s32.totalorder %s1708_s13, %s1708_s13 }
  0x16   : > { %p1710_p0 = pneg %p1909_p12  ;;  %p1718_p7 = por %p1717_p4, %p1716_p3 }
  0x18   : > { %p1711_p1 = pnand %p1710_p0, %p1709_p13 }
  0x1a   : > { %p1712_p2 = pneg %p1711_p1 }
  0x1c   : > { %p1719_p8 = pnand %p1718_p7, %p1712_p2 }
  0x1e   : > { %1722 = shalt.err (!%p1719_p8)
}
  0x1f   : > { %s1808_s14 = smov [#allocation3]   ;;  %s1723_s15 = scalar_lea.vmem %s186_s11, 16 }
  0x20   : > { %1655 = dma.vmem_to_smem (!%p1909_p12), %s175_s8, 64, %s1808_s14, [#allocation5]  }
  0x21   : > { %p1724_p11 = scmp.ne.s32.totalorder %s186_s11, %s1723_s15  ;;  %p1731_p5 = scmp.lt.s32.totalorder %s186_s11, %s186_s11 }
  0x22   : > { %p1732_p10 = scmp.lt.s32.totalorder %s1723_s15, %s1723_s15 }
  0x23   : > { %p1726_p9 = pnand %p1724_p11, %p1710_p0 }
  0x24   : > { %p1733_p13 = por %p1732_p10, %p1731_p5 }
  0x25   : > { %p1727_p6 = pneg %p1726_p9 }
  0x27   : > { %p1734_p1 = pnand %p1733_p13, %p1727_p6 }
  0x29   : > { %1737 = shalt.err (!%p1734_p1)
}
  0x2a   : > { %s1809_s16 = smov [#allocation6]   ;;  %p2667_p2 = scmp.ne.s32.totalorder %s2665_s30, 0 }
  0x2b   : > { %1658 = dma.vmem_to_smem (!%p1909_p12), %s186_s11, 16, %s1809_s16, [#allocation7]  }
  0x2c   : > { %212 = sbr.rel (%p2667_p2) target bundleno = 704 (0x2c0), region = 40  ;;  %p2668_p3 = scmp.eq.s32.totalorder (!%p2667_p2), %s1867_s22, 0 }
  0x31   : > { %1781 = dma.done.wait (%p2668_p3), [#allocation5], 64   ;;  %p2669_p4 = pmov %p2668_p3 }
  0x32   : > { %p2670_p9 = pmov %p2668_p3 }
  0x33   : > { %1783 = vsyncadd (%p2669_p4), [#allocation5], 4294967232 }
  0x34   : > { %1785 = dma.done.wait (%p2670_p9), [#allocation7], 16   ;;  %p2671_p5 = pmov %p2668_p3 }
  0x36   : > { %1787 = vsyncadd (%p2671_p5), [#allocation7], 4294967280 }
  0x37   : > { %222 = sfence }
  0x38   : > { %p245_p6 = scmp.lt.s32.totalorder %s1867_s22, 1  ;;  %s1465_s17 = sld [smem:[#allocation3 + $0x108]]  ;;  %vm297_vm0 = vcmask 1046528   ;;  %vm1147_vm1 = vcmask 1043456   ;;  %vm1131_vm2 = vcmask 64512   ;;  %vm1812_vm3 = vmmov 0  }
  0x39   : > { %s1463_s25 = sld [smem:[#allocation3 + $0x8]]  ;;  %s1810_s15 = smov 127   ;;  %vm1254_vm4 = vcmask 130048  }
  0x3a   : > { %s246_s23 = scalar_select %p245_p6, %s1867_s22, 1 }
  0x3b   : > { %s1478_s30 = sld [smem:[#allocation3 + $0x89]]  ;;  %p2672_p12 = scmp.ne.s32.totalorder %s2663_s28, 0 }
  0x3c   : > { %s1605_s26 = sshll.u32 %s246_s23, 7  ;;  %s1464_s9 = sld [smem:[#allocation3 + $0x88]] }
  0x3d   : > { %s1934_s8 = scalar_lea.vmem %s2654_s0, %s1605_s26  ;;  %s1469_s10 = sld [smem:[#allocation3 + $0x20]] }
  0x3e   : > { %v251_v0 = vld [vmem:[%s1934_s8] ss:$8 sps:$4 sm:$0xff]   ;;  %v252_v1 = vld [vmem:[%s1934_s8 + $0x4] sm:$0x1]  ;;  %v284_v3 = vstv %s1465_s17  ;;  %s1942_s11 = sld [smem:[#allocation3 + $0x9]] }
  0x3f   : > { %v1938_v2 = vunpack.c.l.bf16 %v251_v0  ;;  %v1940_v4 = vunpack.c.h.bf16 %v251_v0  ;;  %s1471_s12 = sld [smem:[#allocation3 + $0x120]]  ;;  %v268_v6 = vstv %s1463_s25  ;;  %v1945_v7 = vunpack.c.l.bf16 %v252_v1  ;;  %v1473_v12 = vld [vmem:[%s1934_s8 + $0xc] sm:$0x1]  ;;  %v1486_v34 = vld [vmem:[%s1934_s8 + $0x10] ss:$8 sps:$4 sm:$0xff]  }
  0x40   : > { %s1947_s13 = sld [smem:[#allocation3 + $0xa0]]  ;;  %v1966_v19 = vunpack.c.l.bf16 %v1473_v12  ;;  %v1487_v38 = vld [vmem:[%s1934_s8 + $0x14] sm:$0x1]  ;;  %v2004_v49 = vunpack.c.l.bf16 %v1486_v34 }
  0x41   : > { %v285_v5 = vmul.f32 %v284_v3, %v1938_v2  ;;  %v269_v8 = vmul.f32 %v268_v6, %v1938_v2  ;;  %v390_v9 = vstv %s1478_s30  ;;  %s1950_s14 = sld [smem:[#allocation3 + $0x21]]  ;;  %v2006_v50 = vunpack.c.l.bf16 %v1487_v38 }
  0x42   : > { %v391_v10 = vmul.f32 %v390_v9, %v1940_v4  ;;  %v276_v11 = vstv %s1464_s9  ;;  %s1955_s16 = sld [smem:[#allocation3 + $0x109]] }
  0x43   : > { %287 = vrot.lane.b32.xlu1 %v285_v5, %s1810_s15  ;;  %271 = vrot.lane.b32.xlu0 %v269_v8, %s1810_s15  ;;  %v277_v13 = vmul.f32 %v276_v11, %v1938_v2  ;;  %v326_v14 = vstv %s1469_s10  ;;  %s1959_s17 = sld [smem:[#allocation3 + $0x121]]  ;;  %v1501_v11 = vld [vmem:[%s1934_s8 + $0x1c] sm:$0x1] }
  0x44   : > { %v327_v15 = vmul.f32 %v326_v14, %v1938_v2  ;;  %v328_v16 = vmul.f32 %v326_v14, %v1945_v7  ;;  %v382_v17 = vstv %s1942_s11  ;;  %s1964_s23 = sld [smem:[#allocation3 + $0xa1]] }
  0x45   : > { %v352_v18 = vstv %s1471_s12  ;;  %v383_v24 = vmul.f32 %v382_v17, %v1940_v4  ;;  %s1977_s25 = sld [smem:[#allocation3 + $0x22]] }
  0x46   : > { %v331_v20 = vrot.slane %v327_v15, 1  ;;  %v332_v21 = vrot.slane %v328_v16, 1  ;;  %v353_v22 = vmul.f32 %v352_v18, %v1938_v2  ;;  %v354_v23 = vmul.f32 %v352_v18, %v1945_v7  ;;  %s1986_s26 = sld [smem:[#allocation3 + $0x8a]] }
  0x47   : > { %393 = vrot.lane.b32.xlu1 %v391_v10, %s1810_s15  ;;  %279 = vrot.lane.b32.xlu0 %v277_v13, %s1810_s15  ;;  %v339_v25 = vstv %s1947_s13  ;;  %v439_v26 = vstv %s1950_s14  ;;  %s1991_s30 = sld [smem:[#allocation3 + $0xa]]  ;;  %v2045_v15 = vunpack.c.h.bf16 %v1486_v34  ;;  %v2047_v16 = vunpack.c.l.bf16 %v1501_v11 }
  0x48   : > { %v333_v27 = vsel %vm297_vm0, %v331_v20, %v332_v21  ;;  %v357_v28 = vrot.slane %v353_v22, 1  ;;  %v358_v29 = vrot.slane %v354_v23, 1  ;;  %v340_v30 = vmul.f32 %v339_v25, %v1938_v2  ;;  %s1996_s6 = sld [smem:[#allocation3 + $0x122]] }
  0x49   : > { %v341_v31 = vmul.f32 %v339_v25, %v1945_v7  ;;  %v440_v32 = vmul.f32 %v439_v26, %v1940_v4  ;;  %v441_v33 = vmul.f32 %v439_v26, %v1966_v19  ;;  %v465_v37 = vstv %s1959_s17  ;;  %s2000_s7 = sld [smem:[#allocation3 + $0xa2]] }
  0x4a   : > { %v359_v35 = vsel %vm297_vm0, %v357_v28, %v358_v29  ;;  %v344_v36 = vrot.slane %v340_v30, 1  ;;  %v466_v42 = vmul.f32 %v465_v37, %v1940_v4  ;;  %v398_v43 = vstv %s1955_s16  ;;  %s2012_s9 = sld [smem:[#allocation3 + $0x10a]] }
  0x4b   : > { %334 = vrot.lane.b32.xlu1 %v333_v27, %s1810_s15  ;;  %385 = vrot.lane.b32.xlu0 %v383_v24, %s1810_s15  ;;  %v345_v39 = vrot.slane %v341_v31, 1  ;;  %v444_v40 = vrot.slane %v440_v32, 1  ;;  %v445_v41 = vrot.slane %v441_v33, 1  ;;  %v467_v44 = vmul.f32 %v465_v37, %v1966_v19  ;;  %s2023_s10 = sld [smem:[#allocation3 + $0x23]] }
  0x4c   : > { %v452_v45 = vstv %s1964_s23  ;;  %v399_v52 = vmul.f32 %v398_v43, %v1940_v4  ;;  %v470_v53 = vrot.slane %v466_v42, 1  ;;  %v552_v57 = vstv %s1977_s25  ;;  %s2029_s11 = sld [smem:[#allocation3 + $0x8b]] }
  0x4d   : > { %v346_v46 = vsel %vm297_vm0, %v344_v36, %v345_v39  ;;  %v453_v47 = vmul.f32 %v452_v45, %v1940_v4  ;;  %v454_v48 = vmul.f32 %v452_v45, %v1966_v19  ;;  %v446_v51 = vsel %vm297_vm0, %v444_v40, %v445_v41  ;;  %s2035_s12 = sld [smem:[#allocation3 + $0x123]]  ;;  %v1546_v36 = vld [vmem:[%s1934_s8 + $0x40] ss:$8 sps:$4 sm:$0xff]   ;;  %v2092_v45 = vld [vmem:[%s1934_s8 + $0x50] ss:$8 sps:$4 sm:$0xff]  }
  0x4e   : > { %v471_v54 = vrot.slane %v467_v44, 1  ;;  %v503_v58 = vstv %s1986_s26  ;;  %v495_v60 = vstv %s1991_s30  ;;  %v553_v61 = vmul.f32 %v552_v57, %v2004_v49  ;;  %s2040_s13 = sld [smem:[#allocation3 + $0xb]] }
  0x4f   : > { %360 = vrot.lane.b32.xlu1 %v359_v35, %s1810_s15  ;;  %347 = vrot.lane.b32.xlu0 %v346_v46, %s1810_s15  ;;  %v457_v55 = vrot.slane %v453_v47, 1  ;;  %v458_v56 = vrot.slane %v454_v48, 1  ;;  %v554_v62 = vmul.f32 %v552_v57, %v2006_v50  ;;  %v578_v0 = vstv %s1996_s6  ;;  %s2042_s14 = sld [smem:[#allocation3 + $0xa3]] }
  0x50   : > { %v472_v59 = vsel %vm297_vm0, %v470_v53, %v471_v54  ;;  %v565_v1 = vstv %s2000_s7  ;;  %v504_v3 = vmul.f32 %v503_v58, %v2004_v49  ;;  %v496_v5 = vmul.f32 %v495_v60, %v2004_v49  ;;  %s2052_s16 = sld [smem:[#allocation3 + $0x10b]] }
  0x51   : > { %v459_v63 = vsel %vm297_vm0, %v457_v55, %v458_v56  ;;  %v557_v6 = vrot.slane %v553_v61, 1  ;;  %v558_v8 = vrot.slane %v554_v62, 1  ;;  %v579_v9 = vmul.f32 %v578_v0, %v2004_v49  ;;  %s2062_s17 = sld [smem:[#allocation3 + $0x94]] }
  0x52   : > { %v580_v10 = vmul.f32 %v578_v0, %v2006_v50  ;;  %v511_v12 = vstv %s2012_s9  ;;  %v566_v13 = vmul.f32 %v565_v1, %v2004_v49  ;;  %v567_v14 = vmul.f32 %v565_v1, %v2006_v50  ;;  %s2066_s23 = sld [smem:[#allocation3 + $0x18]] }
  0x53   : > { %447 = vrot.lane.b32.xlu1 %v446_v51, %s1810_s15  ;;  %401 = vrot.lane.b32.xlu0 %v399_v52, %s1810_s15  ;;  %v559_v17 = vsel %vm297_vm0, %v557_v6, %v558_v8  ;;  %v512_v18 = vmul.f32 %v511_v12, %v2004_v49  ;;  %v583_v20 = vrot.slane %v579_v9, 1  ;;  %v665_v24 = vstv %s2023_s10  ;;  %s2069_s25 = sld [smem:[#allocation3 + $0x14]] }
  0x54   : > { %v584_v21 = vrot.slane %v580_v10, 1  ;;  %v570_v22 = vrot.slane %v566_v13, 1  ;;  %v571_v23 = vrot.slane %v567_v14, 1  ;;  %v616_v25 = vstv %s2029_s11  ;;  %s2076_s26 = sld [smem:[#allocation3 + $0x118]] }
  0x55   : > { %v666_v27 = vmul.f32 %v665_v24, %v2045_v15  ;;  %v667_v28 = vmul.f32 %v665_v24, %v2047_v16  ;;  %v691_v29 = vstv %s2035_s12  ;;  %v608_v31 = vstv %s2040_s13  ;;  %s2081_s30 = sld [smem:[#allocation3 + $0x98]] }
  0x56   : > { %v585_v26 = vsel %vm297_vm0, %v583_v20, %v584_v21  ;;  %v572_v30 = vsel %vm297_vm0, %v570_v22, %v571_v23  ;;  %v678_v32 = vstv %s2042_s14  ;;  %v617_v33 = vmul.f32 %v616_v25, %v2045_v15  ;;  %s2085_s6 = sld [smem:[#allocation3 + $0x15]] }
  0x57   : > { %473 = vrot.lane.b32.xlu1 %v472_v59, %s1810_s15  ;;  %460 = vrot.lane.b32.xlu0 %v459_v63, %s1810_s15  ;;  %v692_v34 = vmul.f32 %v691_v29, %v2045_v15  ;;  %v693_v35 = vmul.f32 %v691_v29, %v2047_v16  ;;  %v609_v37 = vmul.f32 %v608_v31, %v2045_v15  ;;  %v670_v38 = vrot.slane %v666_v27, 1  ;;  %s2094_s7 = sld [smem:[#allocation3 + $0x19]] }
  0x58   : > { %v671_v39 = vrot.slane %v667_v28, 1  ;;  %v624_v40 = vstv %s2052_s16  ;;  %v679_v41 = vmul.f32 %v678_v32, %v2045_v15  ;;  %v680_v42 = vmul.f32 %v678_v32, %v2047_v16  ;;  %s2098_s9 = sld [smem:[#allocation3 + $0x114]] }
  0x59   : > { %v2087_v43 = vunpack.c.l.bf16 %v1546_v36  ;;  %v2089_v44 = vunpack.c.h.bf16 %v1546_v36  ;;  %v625_v46 = vmul.f32 %v624_v40, %v2045_v15  ;;  %v696_v47 = vrot.slane %v692_v34, 1  ;;  %s2106_s10 = sld [smem:[#allocation3 + $0x119]] }
  0x5a   : > { %v697_v48 = vrot.slane %v693_v35, 1  ;;  %v292_v51 = vstv %s2066_s23  ;;  %v672_v52 = vsel %vm297_vm0, %v670_v38, %v671_v39  ;;  %v927_v53 = vstv %s2062_s17  ;;  %s2112_s11 = sld [smem:[#allocation3 + $0x99]] }
  0x5b   : > { %506 = vrot.lane.b32.xlu1 %v504_v3, %s1810_s15  ;;  %498 = vrot.lane.b32.xlu0 %v496_v5, %s1810_s15  ;;  %v293_v54 = vmul.f32 %v292_v51, %v1938_v2  ;;  %v294_v55 = vmul.f32 %v292_v51, %v1945_v7  ;;  %v683_v56 = vrot.slane %v679_v41, 1  ;;  %v684_v57 = vrot.slane %v680_v42, 1  ;;  %s2114_s12 = sld [smem:[#allocation3 + $0x115]] }
  0x5c   : > { %v2109_v58 = vunpack.c.l.bf16 %v2092_v45  ;;  %v315_v59 = vstv %s2076_s26  ;;  %v698_v0 = vsel %vm297_vm0, %v696_v47, %v697_v48  ;;  %v928_v1 = vmul.f32 %v927_v53, %v2087_v43  ;;  %s2122_s13 = sld [smem:[#allocation3 + $0x95]] }
  0x5d   : > { %v298_v60 = vrot.slane %v293_v54, 1  ;;  %v299_v61 = vrot.slane %v294_v55, 1  ;;  %v316_v62 = vmul.f32 %v315_v59, %v1938_v2  ;;  %v317_v63 = vmul.f32 %v315_v59, %v1945_v7  ;;  %s2130_s14 = sld [smem:[#allocation3 + $0x1a]] }
  0x5e   : > { %v919_v3 = vstv %s2069_s25  ;;  %v304_v5 = vstv %s2081_s30  ;;  %v685_v11 = vsel %vm297_vm0, %v683_v56, %v684_v57  ;;  %v958_v12 = vstv %s2085_s6  ;;  %s2134_s16 = sld [smem:[#allocation3 + $0x96]] }
  0x5f   : > { %560 = vrot.lane.b32.xlu1 %v559_v17, %s1810_s15  ;;  %514 = vrot.lane.b32.xlu0 %v512_v18, %s1810_s15  ;;  %v2127_v6 = vsel %vm297_vm0, %v298_v60, %v299_v61  ;;  %v320_v8 = vrot.slane %v316_v62, 1  ;;  %v321_v9 = vrot.slane %v317_v63, 1  ;;  %v305_v10 = vmul.f32 %v304_v5, %v1938_v2  ;;  %s2143_s17 = sld [smem:[#allocation3 + $0x11a]] }
  0x60   : > { %v306_v13 = vmul.f32 %v304_v5, %v1945_v7  ;;  %v406_v14 = vstv %s2094_s7  ;;  %v920_v22 = vmul.f32 %v919_v3, %v2087_v43  ;;  %v428_v24 = vstv %s2106_s10  ;;  %s2149_s23 = sld [smem:[#allocation3 + $0x9a]] }
  0x61   : > { %v2139_v17 = vsel %vm297_vm0, %v320_v8, %v321_v9  ;;  %v309_v18 = vrot.slane %v305_v10, 1  ;;  %v407_v20 = vmul.f32 %v406_v14, %v1940_v4  ;;  %v408_v21 = vmul.f32 %v406_v14, %v1966_v19  ;;  %s2155_s25 = sld [smem:[#allocation3 + $0x16]] }
  0x62   : > { %v310_v23 = vrot.slane %v306_v13, 1  ;;  %v417_v25 = vstv %s2112_s11  ;;  %v429_v27 = vmul.f32 %v428_v24, %v1940_v4  ;;  %v430_v28 = vmul.f32 %v428_v24, %v1966_v19  ;;  %s2166_s26 = sld [smem:[#allocation3 + $0x1b]] }
  0x63   : > { %586 = vrot.lane.b32.xlu1 %v585_v26, %s1810_s15  ;;  %573 = vrot.lane.b32.xlu0 %v572_v30, %s1810_s15  ;;  %v411_v7 = vrot.slane %v407_v20, 1  ;;  %v412_v26 = vrot.slane %v408_v21, 1  ;;  %v935_v29 = vstv %s2098_s9  ;;  %v418_v31 = vmul.f32 %v417_v25, %v1940_v4  ;;  %s2173_s30 = sld [smem:[#allocation3 + $0x17]] }
  0x64   : > { %v2158_v30 = vsel %vm297_vm0, %v309_v18, %v310_v23  ;;  %v419_v32 = vmul.f32 %v417_v25, %v1966_v19  ;;  %v433_v35 = vrot.slane %v429_v27, 1  ;;  %v434_v36 = vrot.slane %v430_v28, 1  ;;  %s2181_s6 = sld [smem:[#allocation3 + $0x116]] }
  0x65   : > { %v2164_v34 = vsel %vm297_vm0, %v411_v7, %v412_v26  ;;  %v422_v38 = vrot.slane %v418_v31, 1  ;;  %v519_v40 = vstv %s2130_s14  ;;  %v936_v19 = vmul.f32 %v935_v29, %v2087_v43  ;;  %s2192_s7 = sld [smem:[#allocation3 + $0x117]] }
  0x66   : > { %v423_v39 = vrot.slane %v419_v32, 1  ;;  %v2176_v41 = vsel %vm297_vm0, %v433_v35, %v434_v36  ;;  %v520_v42 = vmul.f32 %v519_v40, %v2004_v49  ;;  %v966_v47 = vstv %s2122_s13  ;;  %s1510_s9 = sld [smem:[#allocation3 + $0x11b]] }
  0x67   : > { %619 = vrot.lane.b32.xlu1 %v617_v33, %s1810_s15  ;;  %611 = vrot.lane.b32.xlu0 %v609_v37, %s1810_s15  ;;  %v959_v33 = vmul.f32 %v958_v12, %v2089_v44  ;;  %v974_v37 = vstv %s2114_s12  ;;  %v541_v51 = vstv %s2143_s17  ;;  %v967_v62 = vmul.f32 %v966_v47, %v2089_v44  ;;  %s2203_s10 = sld [smem:[#allocation3 + $0x97]] }
  0x68   : > { %v2184_v48 = vsel %vm297_vm0, %v422_v38, %v423_v39  ;;  %v975_v53 = vmul.f32 %v974_v37, %v2089_v44  ;;  %v524_v54 = vrot.slane %v520_v42, 1  ;;  %v542_v56 = vmul.f32 %v541_v51, %v2004_v49  ;;  %s1509_s11 = sld [smem:[#allocation3 + $0x9b]] }
  0x69   : > { %v1005_v57 = vstv %s2134_s16  ;;  %v543_v59 = vmul.f32 %v541_v51, %v2006_v50  ;;  %v632_v10 = vstv %s2166_s26  ;;  %v1036_v18 = vstv %s2173_s30  ;;  %s1462_s14 = sld [smem:[#allocation3 + $0x100]] }
  0x6a   : > { %v1006_v9 = vmul.f32 %v1005_v57, %v2109_v58  ;;  %v633_v13 = vmul.f32 %v632_v10, %v2045_v15  ;;  %v634_v14 = vmul.f32 %v632_v10, %v2047_v16  ;;  %v1013_v20 = vstv %s2181_s6  ;;  %s255_s16 = sld [smem:[#allocation3]] }
  0x6b   : > { %673 = vrot.lane.b32.xlu1 %v672_v52, %s1810_s15  ;;  %627 = vrot.lane.b32.xlu0 %v625_v46, %s1810_s15  ;;  %v521_v46 = vmul.f32 %v519_v40, %v2006_v50  ;;  %v530_v52 = vstv %s2149_s23  ;;  %v547_v3 = vrot.slane %v543_v59, 1  ;;  %v1014_v7 = vmul.f32 %v1013_v20, %v2109_v58  ;;  %s1461_s17 = sld [smem:[#allocation3 + $0x80]] }
  0x6c   : > { %v531_v60 = vmul.f32 %v530_v52, %v2004_v49  ;;  %v532_v61 = vmul.f32 %v530_v52, %v2006_v50  ;;  %v2207_v50 = vunpack.c.h.bf16 %v2092_v45  ;;  %v637_v21 = vrot.slane %v633_v13, 1  ;;  %s1476_s23 = sld [smem:[#allocation3 + $0x101]] }
  0x6d   : > { %v525_v55 = vrot.slane %v521_v46, 1  ;;  %v654_v25 = vstv %s1510_s9  ;;  %v1052_v26 = vstv %s2192_s7  ;;  %v1044_v27 = vstv %s2203_s10  ;;  %v1140_v46 = vld [vmem:[%s2658_s4] sm:$0xf]  ;;  %s2258_s26 = sld [smem:[#allocation3 + $0x2]] }
  0x6e   : > { %v535_v5 = vrot.slane %v531_v60, 1  ;;  %v536_v8 = vrot.slane %v532_v61, 1  ;;  %v1037_v23 = vmul.f32 %v1036_v18, %v2207_v50  ;;  %v655_v28 = vmul.f32 %v654_v25, %v2045_v15  ;;  %1639 = vmatprep.subr.msk.bf16.mxu0 %vm1147_vm1, %v1140_v46  ;;  %s2260_s30 = sld [smem:[#allocation3 + $0x82]]  ;;  %v1514_v18 = vld [vmem:[%s1934_s8 + $0x20] ss:$8 sps:$4 sm:$0xff]  }
  0x6f   : > { %699 = vrot.lane.b32.xlu1 %v698_v0, %s1810_s15  ;;  %686 = vrot.lane.b32.xlu0 %v685_v11, %s1810_s15  ;;  %v2200_v63 = vsel %vm297_vm0, %v524_v54, %v525_v55  ;;  %v546_v0 = vrot.slane %v542_v56, 1  ;;  %v656_v29 = vmul.f32 %v654_v25, %v2047_v16  ;;  %v1053_v31 = vmul.f32 %v1052_v26, %v2207_v50  ;;  %s2263_s6 = sld [smem:[#allocation3 + $0x102]] }
  0x70   : > { %v2215_v12 = vsel %vm297_vm0, %v535_v5, %v536_v8  ;;  %v659_v32 = vrot.slane %v655_v28, 1  ;;  %v1045_v35 = vmul.f32 %v1044_v27, %v2207_v50  ;;  %v643_v37 = vstv %s1509_s11  ;;  %s2266_s7 = sld [smem:[#allocation3 + $0x1c]]  ;;  %v1523_v28 = vld [vmem:[%s1934_s8 + $0x2c] sm:$0x1] }
  0x71   : > { %v2212_v11 = vsel %vm297_vm0, %v546_v0, %v547_v3  ;;  %v644_v38 = vmul.f32 %v643_v37, %v2045_v15  ;;  %v645_v39 = vmul.f32 %v643_v37, %v2047_v16  ;;  %v1149_v47 = vsel %vm1147_vm1, %v1140_v46, 0  ;;  %s2268_s9 = sld [smem:[#allocation3 + $0x83]] }
  0x72   : > { %1616 = vmatpush3.bf16.msra.mxu0 %v1149_v47  ;;  %v264_v16 = vstv %s1462_s14  ;;  %v256_v51 = vstv %s255_s16  ;;  %v260_v54 = vstv %s1461_s17  ;;  %s2270_s10 = sld [smem:[#allocation3 + $0x3]]  ;;  %v2283_v27 = vunpack.c.l.bf16 %v1514_v18 }
  0x73   : > { %930 = vrot.lane.b32.xlu1 %v928_v1, %s1810_s15  ;;  %922 = vrot.lane.b32.xlu0 %v920_v22, %s1810_s15  ;;  %v997_v1 = vstv %s2155_s25  ;;  %v638_v22 = vrot.slane %v634_v14, 1  ;;  %v648_v40 = vrot.slane %v644_v38, 1  ;;  %v265_v52 = vmul.f32 %v264_v16, %v1938_v2  ;;  %s1475_s25 = sld [smem:[#allocation3 + $0x81]] }
  0x74   : > { %v998_v45 = vmul.f32 %v997_v1, %v2109_v58  ;;  %v261_v60 = vmul.f32 %v260_v54, %v1938_v2  ;;  %s2274_s11 = sld [smem:[#allocation3 + $0x4]] }
  0x75   : > { %v2226_v24 = vsel %vm297_vm0, %v637_v21, %v638_v22  ;;  %v483_v21 = vstv %s2258_s26  ;;  %v1515_v22 = vld [vmem:[%s1934_s8 + $0x24] sm:$0x1]  ;;  %s2279_s12 = sld [smem:[#allocation3 + $0x1d]]  ;;  %v491_v16 = vstv %s2263_s6 }
  0x76   : > { %s2281_s13 = sld [smem:[#allocation3 + $0x5]] }
  0x77   : > { %961 = vrot.lane.b32.xlu1 %v959_v33, %s1810_s15  ;;  %938 = vrot.lane.b32.xlu0 %v936_v19, %s1810_s15  ;;  %v660_v33 = vrot.slane %v656_v29, 1  ;;  %v649_v19 = vrot.slane %v645_v39, 1  ;;  %s2286_s14 = sld [smem:[#allocation3 + $0x11c]]  ;;  %v487_v39 = vstv %s2260_s30 }
  0x78   : > { %s2301_s16 = sld [smem:[#allocation3 + $0x103]] }
  0x79   : > { %v2239_v36 = vsel %vm297_vm0, %v659_v32, %v660_v33  ;;  %v2246_v42 = vsel %vm297_vm0, %v648_v40, %v649_v19  ;;  %v374_v13 = vstv %s1475_s25  ;;  %v484_v32 = vmul.f32 %v483_v21, %v2004_v49  ;;  %s2305_s17 = sld [smem:[#allocation3 + $0x11d]] }
  0x7a   : > { %v2291_v33 = vunpack.c.l.bf16 %v1515_v22  ;;  %v721_v40 = vstv %s2266_s7  ;;  %v2296_v19 = vunpack.c.h.bf16 %v1514_v18  ;;  %s2326_s25 = sld [smem:[#allocation3 + $0x105]] }
  0x7b   : > { %977 = vrot.lane.b32.xlu1 %v975_v53, %s1810_s15  ;;  %969 = vrot.lane.b32.xlu0 %v967_v62, %s1810_s15  ;;  %v257_v53 = vmul.f32 %v256_v51, %v1938_v2  ;;  %v2299_v51 = vunpack.c.l.bf16 %v1523_v28  ;;  %s2332_s26 = sld [smem:[#allocation3 + $0x9d]] }
  0x7c   : > { %s2340_s30 = sld [smem:[#allocation3 + $0x9e]] }
  0x7d   : > { %s2352_s6 = sld [smem:[#allocation3 + $0x84]] }
  0x7e   : > { %v604_v28 = vstv %s2301_s16  ;;  %s2358_s7 = sld [smem:[#allocation3 + $0x85]] }
  0x7f   : > { %1008 = vrot.lane.b32.xlu1 %v1006_v9, %s1810_s15  ;;  %1000 = vrot.lane.b32.xlu0 %v998_v45, %s1810_s15  ;;  %s2399_s16 = sld [smem:[#allocation3 + $0x1f]] }
  0x83   : > { %1039 = vrot.lane.b32.xlu1 %v1037_v23, %s1810_s15  ;;  %1016 = vrot.lane.b32.xlu0 %v1014_v7, %s1810_s15 }
  0x87   : > { %1055 = vrot.lane.b32.xlu1 %v1053_v31, %s1810_s15  ;;  %1047 = vrot.lane.b32.xlu0 %v1045_v35, %s1810_s15  ;;  %s1474_s15 = sld [smem:[#allocation3 + $0x1]]  ;;  %v1531_v35 = vld [vmem:[%s1934_s8 + $0x34] sm:$0x1] }
  0x88   : > { %v2307_v54 = vunpack.c.l.bf16 %v1531_v35  ;;  %v793_v35 = vstv %s2305_s17  ;;  %s2403_s17 = sld [smem:[#allocation3 + $0x7]] }
  0x8d   : > { %v370_v1 = vstv %s1474_s15  ;;  %s2315_s15 = sld [smem:[#allocation3 + $0x104]] }
  0x8e   : > { %v371_v8 = vmul.f32 %v370_v1, %v1940_v4 }
  0xb5   : > { %v288_v55 = vpop.permute.xlu1 %287  ;;  %v272_v57 = vpop.permute.xlu0 %271 }
  0xb6   : > { %v290_v56 = vadd.f32 %v288_v55, %v265_v52  ;;  %v274_v59 = vadd.f32 %v272_v57, %v257_v53  ;;  %v1539_v55 = vld [vmem:[%s1934_s8 + $0x3c] sm:$0x1]  ;;  %v488_v57 = vmul.f32 %v487_v39, %v2004_v49 }
  0xb8   : > { %v324_v61 = vadd.f32 %v2139_v17, %v290_v56  ;;  %v302_v0 = vadd.f32 %v2127_v6, %v274_v59  ;;  %v378_v17 = vstv %s1476_s23  ;;  %s2321_s23 = sld [smem:[#allocation3 + $0x9c]] }
  0xb9   : > { %v394_v62 = vpop.permute.xlu1 %393  ;;  %v280_v3 = vpop.permute.xlu0 %279  ;;  %v379_v45 = vmul.f32 %v378_v17, %v1940_v4  ;;  %v709_v17 = vstv %s2274_s11  ;;  %s2372_s11 = sld [smem:[#allocation3 + $0x1e]] }
  0xba   : > { %v282_v5 = vadd.f32 %v280_v3, %v261_v60  ;;  %v722_v60 = vmul.f32 %v721_v40, %v2283_v27  ;;  %v492_v3 = vmul.f32 %v491_v16, %v2004_v49 }
  0xbc   : > { %v313_v2 = vadd.f32 %v2158_v30, %v282_v5  ;;  %v375_v30 = vmul.f32 %v374_v13, %v1940_v4  ;;  %v1530_v4 = vld [vmem:[%s1934_s8 + $0x30] ss:$8 sps:$4 sm:$0xff]   ;;  %v771_v5 = vstv %s2279_s12  ;;  %s2382_s12 = sld [smem:[#allocation3 + $0x9f]] }
  0xbd   : > { %v335_v9 = vpop.permute.xlu1 %334  ;;  %v386_v10 = vpop.permute.xlu0 %385  ;;  %v2310_v56 = vunpack.c.h.bf16 %v1530_v4  ;;  %v773_v18 = vmul.f32 %v771_v5, %v2299_v51 }
  0xbe   : > { %v337_v6 = vadd.f32 %v335_v9, %v302_v0  ;;  %v600_v9 = vstv %s2268_s9  ;;  %s2364_s9 = sld [smem:[#allocation3 + $0x86]] }
  0xbf   : > { %v2337_v22 = vmul.f32 %v600_v9, %v2045_v15  ;;  %v777_v39 = vrot.slane %v773_v18, 1  ;;  %v713_v18 = vstv %s2352_s6  ;;  %s2458_s6 = sld [smem:[#allocation3 + $0xd]] }
  0xc0   : > { %v372_v14 = vadd.f32 %v371_v8, %v337_v6  ;;  %v2328_v6 = vunpack.c.l.bf16 %v1539_v55 }
  0xc1   : > { %v361_v20 = vpop.permute.xlu1 %360  ;;  %v348_v7 = vpop.permute.xlu0 %347 }
  0xc2   : > { %v388_v23 = vadd.f32 %v386_v10, %v372_v14  ;;  %v363_v25 = vadd.f32 %v361_v20, %v324_v61  ;;  %v350_v26 = vadd.f32 %v348_v7, %v313_v2  ;;  %v723_v61 = vmul.f32 %v721_v40, %v2291_v33 }
  0xc3   : > { %v596_v2 = vstv %s2270_s10  ;;  %v759_v14 = vstv %s2281_s13  ;;  %v2343_v7 = vmul.f32 %v709_v17, %v2283_v27  ;;  %v717_v40 = vstv %s2315_s15  ;;  %s2369_s10 = sld [smem:[#allocation3 + $0x87]] }
  0xc4   : > { %v415_v29 = vadd.f32 %v2164_v34, %v388_v23  ;;  %v380_v31 = vadd.f32 %v379_v45, %v363_v25  ;;  %v376_v37 = vadd.f32 %v375_v30, %v350_v26  ;;  %v2303_v34 = vunpack.c.l.bf16 %v1530_v4  ;;  %s2389_s13 = sld [smem:[#allocation3 + $0x8c]] }
  0xc5   : > { %v448_v38 = vpop.permute.xlu1 %447  ;;  %v402_v47 = vpop.permute.xlu0 %401  ;;  %v727_v49 = vrot.slane %v723_v61, 1  ;;  %v772_v45 = vmul.f32 %v771_v5, %v2296_v19  ;;  %v597_v23 = vmul.f32 %v596_v2, %v2045_v15  ;;  %v2346_v26 = vmul.f32 %v759_v14, %v2296_v19  ;;  %s2408_s15 = sld [smem:[#allocation3 + $0x11e]] }
  0xc6   : > { %v450_v46 = vadd.f32 %v448_v38, %v415_v29  ;;  %v404_v52 = vadd.f32 %v402_v47, %v380_v31  ;;  %v396_v53 = vadd.f32 %v394_v62, %v376_v37  ;;  %v795_v61 = vmul.f32 %v793_v35, %v2299_v51 }
  0xc7   : > { %v776_v38 = vrot.slane %v772_v45, 1 }
  0xc8   : > { %v485_v59 = vadd.f32 %v484_v32, %v450_v46  ;;  %v437_v0 = vadd.f32 %v2176_v41, %v404_v52  ;;  %v426_v1 = vadd.f32 %v2184_v48, %v396_v53  ;;  %v743_v41 = vstv %s2286_s14  ;;  %s2393_s14 = sld [smem:[#allocation3 + $0x6]] }
  0xc9   : > { %v474_v62 = vpop.permute.xlu1 %473  ;;  %v461_v8 = vpop.permute.xlu0 %460  ;;  %v726_v48 = vrot.slane %v722_v60, 1  ;;  %v744_v4 = vmul.f32 %v743_v41, %v2283_v27  ;;  %v745_v32 = vmul.f32 %v743_v41, %v2291_v33  ;;  %v605_v52 = vmul.f32 %v604_v28, %v2045_v15 }
  0xca   : > { %v476_v10 = vadd.f32 %v474_v62, %v437_v0  ;;  %v463_v13 = vadd.f32 %v461_v8, %v426_v1  ;;  %v732_v53 = vstv %s2321_s23  ;;  %v794_v60 = vmul.f32 %v793_v35, %v2296_v19  ;;  %s2423_s23 = sld [smem:[#allocation3 + $0x106]] }
  0xcb   : > { %v2355_v37 = vsel %vm297_vm0, %v726_v48, %v727_v49  ;;  %v782_v1 = vstv %s2332_s26  ;;  %v2375_v15 = vsel %vm297_vm0, %v776_v38, %v777_v39  ;;  %v734_v5 = vmul.f32 %v732_v53, %v2291_v33  ;;  %s2436_s26 = sld [smem:[#allocation3 + $0xc]] }
  0xcc   : > { %v489_v30 = vadd.f32 %v488_v57, %v463_v13  ;;  %v493_v21 = vadd.f32 %v492_v3, %v476_v10  ;;  %v748_v57 = vrot.slane %v744_v4, 1  ;;  %v733_v3 = vmul.f32 %v732_v53, %v2283_v27 }
  0xcd   : > { %v507_v20 = vpop.permute.xlu1 %506  ;;  %v499_v25 = vpop.permute.xlu0 %498  ;;  %v832_v10 = vstv %s2340_s30  ;;  %v798_v14 = vrot.slane %v794_v60, 1  ;;  %v799_v41 = vrot.slane %v795_v61, 1  ;;  %v783_v48 = vmul.f32 %v782_v1, %v2296_v19  ;;  %s2454_s30 = sld [smem:[#allocation3 + $0x107]] }
  0xce   : > { %v509_v29 = vadd.f32 %v507_v20, %v489_v30  ;;  %v501_v31 = vadd.f32 %v499_v25, %v485_v59  ;;  %v767_v59 = vstv %s2326_s25  ;;  %v784_v33 = vmul.f32 %v782_v1, %v2299_v51  ;;  %s2428_s25 = sld [smem:[#allocation3 + $0x11f]] }
  0xcf   : > { %v2386_v17 = vmul.f32 %v767_v59, %v2296_v19  ;;  %v737_v20 = vrot.slane %v733_v3, 1  ;;  %v738_v30 = vrot.slane %v734_v5, 1  ;;  %v813_v4 = vstv %s2364_s9  ;;  %s2478_s9 = sld [smem:[#allocation3 + $0x10d]] }
  0xd0   : > { %v528_v47 = vadd.f32 %v2200_v63, %v501_v31  ;;  %v539_v16 = vadd.f32 %v2215_v12, %v509_v29  ;;  %v749_v63 = vrot.slane %v745_v32, 1  ;;  %v2378_v12 = vmul.f32 %v717_v40, %v2283_v27 }
  0xd1   : > { %v561_v46 = vpop.permute.xlu1 %560  ;;  %v515_v55 = vpop.permute.xlu0 %514  ;;  %v834_v29 = vmul.f32 %v832_v10, %v2307_v54  ;;  %v2411_v32 = vsel %vm297_vm0, %v798_v14, %v799_v41  ;;  %v714_v35 = vmul.f32 %v713_v18, %v2283_v27  ;;  %v787_v38 = vrot.slane %v783_v48, 1 }
  0xd2   : > { %v563_v62 = vadd.f32 %v561_v46, %v528_v47  ;;  %v517_v0 = vadd.f32 %v515_v55, %v493_v21  ;;  %v2396_v45 = vsel %vm297_vm0, %v748_v57, %v749_v63  ;;  %v763_v21 = vstv %s2358_s7  ;;  %s2471_s7 = sld [smem:[#allocation3 + $0x10c]] }
  0xd3   : > { %v788_v39 = vrot.slane %v784_v33, 1  ;;  %v863_v47 = vstv %s2369_s10  ;;  %v2421_v53 = vmul.f32 %v813_v4, %v2303_v34  ;;  %v838_v60 = vrot.slane %v834_v29, 1  ;;  %s2482_s10 = sld [smem:[#allocation3 + $0x8d]] }
  0xd4   : > { %v550_v9 = vadd.f32 %v2212_v11, %v517_v0  ;;  %v598_v2 = vadd.f32 %v597_v23, %v563_v62  ;;  %v833_v23 = vmul.f32 %v832_v10, %v2303_v34  ;;  %v882_v61 = vstv %s2382_s12  ;;  %s2497_s12 = sld [smem:[#allocation3 + $0x8e]] }
  0xd5   : > { %v587_v8 = vpop.permute.xlu1 %586  ;;  %v574_v13 = vpop.permute.xlu0 %573  ;;  %v2431_v62 = vmul.f32 %v863_v47, %v2310_v56  ;;  %v911_v0 = vstv %s2389_s13  ;;  %v789_v3 = vsel %vm297_vm0, %v787_v38, %v788_v39  ;;  %v871_v5 = vstv %s2399_s16  ;;  %s2505_s16 = sld [smem:[#allocation3 + $0x10e]] }
  0xd6   : > { %v589_v49 = vadd.f32 %v587_v8, %v550_v9  ;;  %v576_v11 = vadd.f32 %v574_v13, %v539_v16  ;;  %v739_v16 = vsel %vm297_vm0, %v737_v20, %v738_v30  ;;  %v837_v55 = vrot.slane %v833_v23, 1  ;;  %s2521_s13 = sld [smem:[#allocation3 + $0x12]] }
  0xd7   : > { %v2441_v8 = vmul.f32 %v882_v61, %v2310_v56  ;;  %v2444_v9 = vmul.f32 %v882_v61, %v2328_v6  ;;  %v859_v10 = vstv %s2403_s17  ;;  %v843_v33 = vstv %s2408_s15  ;;  %s2511_s17 = sld [smem:[#allocation3 + $0x10]] }
  0xd8   : > { %v602_v25 = vadd.f32 %v2337_v22, %v576_v11  ;;  %v606_v28 = vadd.f32 %v605_v52, %v589_v49  ;;  %v821_v22 = vstv %s2372_s11  ;;  %v2418_v52 = vmul.f32 %v763_v21, %v2296_v19  ;;  %s2489_s11 = sld [smem:[#allocation3 + $0xe]] }
  0xd9   : > { %v620_v51 = vpop.permute.xlu1 %619  ;;  %v612_v31 = vpop.permute.xlu0 %611  ;;  %v822_v63 = vmul.f32 %v821_v22, %v2303_v34  ;;  %v823_v1 = vmul.f32 %v821_v22, %v2307_v54  ;;  %v2451_v48 = vsel %vm297_vm0, %v837_v55, %v838_v60  ;;  %v872_v20 = vmul.f32 %v871_v5, %v2310_v56  ;;  %s2515_s15 = sld [smem:[#allocation3 + $0x11]] }
  0xda   : > { %v622_v40 = vadd.f32 %v620_v51, %v602_v25  ;;  %v614_v46 = vadd.f32 %v612_v31, %v598_v2  ;;  %v809_v2 = vstv %s2393_s14  ;;  %v873_v30 = vmul.f32 %v871_v5, %v2328_v6  ;;  %s2501_s14 = sld [smem:[#allocation3 + $0xf]] }
  0xdb   : > { %v826_v11 = vrot.slane %v822_v63, 1  ;;  %v827_v18 = vrot.slane %v823_v1, 1  ;;  %v810_v23 = vmul.f32 %v809_v2, %v2303_v34  ;;  %v860_v51 = vmul.f32 %v859_v10, %v2310_v56 }
  0xdc   : > { %v641_v57 = vadd.f32 %v2226_v24, %v614_v46  ;;  %v652_v59 = vadd.f32 %v2246_v42, %v622_v40  ;;  %v817_v25 = vstv %s2423_s23  ;;  %v845_v4 = vmul.f32 %v843_v33, %v2307_v54  ;;  %s2525_s23 = sld [smem:[#allocation3 + $0x10f]] }
  0xdd   : > { %v674_v27 = vpop.permute.xlu1 %673  ;;  %v628_v19 = vpop.permute.xlu0 %627  ;;  %v828_v40 = vsel %vm297_vm0, %v826_v11, %v827_v18  ;;  %v876_v46 = vrot.slane %v872_v20, 1  ;;  %v877_v47 = vrot.slane %v873_v30, 1  ;;  %v907_v22 = vstv %s2436_s26  ;;  %s2530_s26 = sld [smem:[#allocation3 + $0x13]] }
  0xde   : > { %v676_v24 = vadd.f32 %v674_v27, %v641_v57  ;;  %v630_v42 = vadd.f32 %v628_v19, %v606_v28  ;;  %v844_v28 = vmul.f32 %v843_v33, %v2303_v34  ;;  %v849_v57 = vrot.slane %v845_v4, 1 }
  0xdf   : > { %v888_v63 = vrot.slane %v2444_v9, 1  ;;  %v908_v1 = vmul.f32 %v907_v22, %v2087_v43  ;;  %v912_v33 = vmul.f32 %v911_v0, %v2087_v43  ;;  %v950_v0 = vstv %s2482_s10  ;;  %s2553_s10 = sld [smem:[#allocation3 + $0x91]] }
  0xe0   : > { %v711_v13 = vadd.f32 %v2343_v7, %v676_v24  ;;  %v663_v41 = vadd.f32 %v2239_v36, %v630_v42 }
  0xe1   : > { %v700_v14 = vpop.permute.xlu1 %699  ;;  %v687_v49 = vpop.permute.xlu0 %686 }
  0xe2   : > { %v730_v7 = vadd.f32 %v2355_v37, %v711_v13  ;;  %v702_v21 = vadd.f32 %v700_v14, %v663_v41  ;;  %v689_v36 = vadd.f32 %v687_v49, %v652_v59  ;;  %v893_v37 = vstv %s2428_s25  ;;  %s2527_s25 = sld [smem:[#allocation3 + $0x8f]] }
  0xe3   : > { %v894_v59 = vmul.f32 %v893_v37, %v2310_v56  ;;  %v895_v60 = vmul.f32 %v893_v37, %v2328_v6  ;;  %v946_v6 = vstv %s2458_s6  ;;  %s2540_s6 = sld [smem:[#allocation3 + $0x111]] }
  0xe4   : > { %v761_v29 = vadd.f32 %v2346_v26, %v730_v7  ;;  %v719_v31 = vadd.f32 %v2378_v12, %v702_v21  ;;  %v715_v38 = vadd.f32 %v714_v35, %v689_v36  ;;  %v818_v12 = vmul.f32 %v817_v25, %v2303_v34 }
  0xe5   : > { %v2468_v39 = vpop.permute.xlu1 %930  ;;  %v923_v55 = vpop.permute.xlu0 %922  ;;  %v848_v35 = vrot.slane %v844_v28, 1  ;;  %v887_v34 = vrot.slane %v2441_v8, 1  ;;  %v898_v10 = vrot.slane %v894_v59, 1  ;;  %v899_v9 = vrot.slane %v895_v60, 1 }
  0xe6   : > { %v780_v27 = vadd.f32 %v2375_v15, %v761_v29  ;;  %v752_v54 = vadd.f32 %v2396_v45, %v719_v31  ;;  %v741_v26 = vadd.f32 %v739_v16, %v715_v38  ;;  %v867_v16 = vstv %s2454_s30  ;;  %s2537_s30 = sld [smem:[#allocation3 + $0x110]] }
  0xe7   : > { %v850_v2 = vsel %vm297_vm0, %v848_v35, %v849_v57  ;;  %v868_v8 = vmul.f32 %v867_v16, %v2310_v56  ;;  %v889_v41 = vsel %vm297_vm0, %v887_v34, %v888_v63  ;;  %v947_v18 = vmul.f32 %v946_v6, %v2089_v44  ;;  %v1582_v35 = vld [vmem:[%s1934_s8 + $0x70] ss:$8 sps:$4 sm:$0xff]  }
  0xe8   : > { %v769_v61 = vadd.f32 %v2386_v17, %v752_v54  ;;  %v765_v15 = vadd.f32 %v2418_v52, %v741_v26  ;;  %v811_v19 = vadd.f32 %v810_v23, %v780_v27  ;;  %v878_v52 = vsel %vm297_vm0, %v876_v46, %v877_v47  ;;  %v1574_v46 = vld [vmem:[%s1934_s8 + $0x60] ss:$8 sps:$4 sm:$0xff]   ;;  %s2556_s8 = sld [smem:[#allocation3 + $0x113]] }
  0xe9   : > { %v2486_v45 = vpop.permute.xlu1 %961  ;;  %v939_v24 = vpop.permute.xlu0 %938  ;;  %v900_v30 = vsel %vm297_vm0, %v898_v10, %v899_v9  ;;  %v954_v21 = vstv %s2478_s9  ;;  %v951_v29 = vmul.f32 %v950_v0, %v2089_v44  ;;  %v993_v27 = vstv %s2505_s16  ;;  %s2547_s9 = sld [smem:[#allocation3 + $0x112]] }
  0xea   : > { %v802_v42 = vadd.f32 %v2411_v32, %v769_v61  ;;  %v791_v17 = vadd.f32 %v789_v3, %v765_v15  ;;  %v830_v5 = vadd.f32 %v828_v40, %v811_v19  ;;  %v915_v32 = vstv %s2471_s7  ;;  %s2542_s7 = sld [smem:[#allocation3 + $0x90]] }
  0xeb   : > { %v916_v7 = vmul.f32 %v915_v32, %v2087_v43  ;;  %v955_v4 = vmul.f32 %v954_v21, %v2089_v44  ;;  %v1024_v40 = vstv %s2501_s14  ;;  %v1063_v60 = vstv %s2511_s17  ;;  %s2569_s14 = sld [smem:[#allocation6]] }
  0xec   : > { %v815_v13 = vadd.f32 %v2421_v53, %v791_v17  ;;  %v861_v14 = vadd.f32 %v860_v51, %v830_v5  ;;  %v819_v3 = vadd.f32 %v818_v12, %v802_v42  ;;  %v985_v51 = vstv %s2489_s11  ;;  %s2559_s11 = sld [smem:[#allocation3 + $0x92]] }
  0xed   : > { %v978_v49 = vpop.permute.xlu1 %977  ;;  %v970_v56 = vpop.permute.xlu0 %969  ;;  %v986_v38 = vmul.f32 %v985_v51, %v2109_v58  ;;  %v1061_v12 = vunpack.c.l.bf16 %v1574_v46  ;;  %v1025_v59 = vmul.f32 %v1024_v40, %v2207_v50  ;;  %v994_v61 = vmul.f32 %v993_v27, %v2109_v58  ;;  %s2575_s16 = sld [smem:[#allocation6 + $0x2]] }
  0xee   : > { %v841_v11 = vadd.f32 %v2451_v48, %v815_v13  ;;  %v880_v53 = vadd.f32 %v878_v52, %v861_v14  ;;  %v852_v20 = vadd.f32 %v850_v2, %v819_v3  ;;  %v1076_v16 = vunpack.c.h.bf16 %v1574_v46  ;;  %s1590_s17 = sld [smem:[#allocation6 + $0x1]] }
  0xef   : > { %v1091_v34 = vunpack.c.l.bf16 %v1582_v35  ;;  %v1028_v6 = vstv %s2527_s25  ;;  %v1078_v17 = vstv %s2515_s15  ;;  %v1064_v52 = vmul.f32 %v1063_v60, %v1061_v12 }
  0xf0   : > { %v865_v36 = vadd.f32 %v2431_v62, %v841_v11  ;;  %v909_v23 = vadd.f32 %v908_v1, %v880_v53  ;;  %v869_v48 = vadd.f32 %v868_v8, %v852_v20  ;;  %v989_v62 = vstv %s2497_s12  ;;  %s2565_s12 = sld [smem:[#allocation3 + $0x93]] }
  0xf1   : > { %v1009_v31 = vpop.permute.xlu1 %1008  ;;  %v1001_v37 = vpop.permute.xlu0 %1000  ;;  %v990_v57 = vmul.f32 %v989_v62, %v2109_v58  ;;  %v1093_v5 = vstv %s2521_s13  ;;  %v1071_v8 = vstv %s2537_s30  ;;  %v1029_v14 = vmul.f32 %v1028_v6, %v2207_v50  ;;  %s1641_s30 = smul.u32 768, %s1867_s22 }
  0xf2   : > { %v891_v25 = vadd.f32 %v889_v41, %v865_v36  ;;  %v925_v28 = vadd.f32 %v923_v55, %v909_v23  ;;  %v902_v43 = vadd.f32 %v900_v30, %v869_v48  ;;  %v1079_v32 = vmul.f32 %v1078_v17, %v1076_v16 }
  0xf3   : > { %v1106_v3 = vunpack.c.h.bf16 %v1582_v35  ;;  %v1108_v41 = vstv %s2530_s26  ;;  %v1086_v53 = vstv %s2540_s6  ;;  %v1072_v20 = vmul.f32 %v1071_v8, %v1061_v12 }
  0xf4   : > { %v913_v47 = vadd.f32 %v912_v33, %v891_v25  ;;  %v948_v22 = vadd.f32 %v947_v18, %v925_v28  ;;  %v917_v55 = vadd.f32 %v916_v7, %v902_v43  ;;  %v1067_v33 = vstv %s2542_s7 }
  0xf5   : > { %v1040_v63 = vpop.permute.xlu1 %1039  ;;  %v1017_v1 = vpop.permute.xlu0 %1016  ;;  %v1094_v18 = vmul.f32 %v1093_v5, %v1091_v34  ;;  %v1101_v30 = vstv %s2547_s9  ;;  %v1082_v21 = vstv %s2553_s10  ;;  %v1068_v23 = vmul.f32 %v1067_v33, %v1061_v12  ;;  %s2611_s10 = scalar_lea.hbm %s2659_s5, %s1641_s30 }
  0xf6   : > { %v933_v44 = vadd.f32 %v2468_v39, %v913_v47  ;;  %v964_v54 = vadd.f32 %v2486_v45, %v948_v22  ;;  %v941_v26 = vadd.f32 %v939_v24, %v917_v55  ;;  %v1032_v45 = vstv %s2525_s23  ;;  %s242_s23 = sand.u32 1, %s1798_s19  }
  0xf7   : > { %v1033_v2 = vmul.f32 %v1032_v45, %v2207_v50  ;;  %v1109_v51 = vmul.f32 %v1108_v41, %v1106_v3  ;;  %v1087_v25 = vmul.f32 %v1086_v53, %v1076_v16  ;;  %v1116_v28 = vstv %s2556_s8  ;;  %s1640_s25 = smul.u32 48, %s242_s23  ;;  %s2614_s22 = scalar_lea.sflag [#allocation4], %s242_s23 }
  0xf8   : > { %v956_v15 = vadd.f32 %v955_v4, %v941_v26  ;;  %v952_v39 = vadd.f32 %v951_v29, %v933_v44  ;;  %v987_v19 = vadd.f32 %v986_v38, %v964_v54  ;;  %v1097_v43 = vstv %s2559_s11  ;;  %s1813_s11 = smov [#allocation8]  }
  0xf9   : > { %v1056_v7 = vpop.permute.xlu1 %1055  ;;  %v1048_v0 = vpop.permute.xlu0 %1047  ;;  %v1083_v62 = vmul.f32 %v1082_v21, %v1076_v16  ;;  %v1102_v38 = vmul.f32 %v1101_v30, %v1091_v34  ;;  %v1098_v47 = vmul.f32 %v1097_v43, %v1091_v34  ;;  %v1120_v55 = vstv %s2569_s14  ;;  %s244_s26 = scalar_lea.vmem [#allocation8], %s1640_s25 }
  0xfa   : > { %v980_v58 = vadd.f32 %v978_v49, %v956_v15  ;;  %v972_v24 = vadd.f32 %v970_v56, %v952_v39  ;;  %v1003_v42 = vadd.f32 %v1001_v37, %v987_v19  ;;  %v1112_v37 = vstv %s2565_s12  ;;  %s1367_s6 = sshll.u32 %s244_s26, 4  ;;  %s1742_s12 = sshll.u32 %s1813_s11, 4  ;;  %s2606_s6 = int_to_ptr.vmem [resolvable:$true] %s1367_s6  ;;  %s1743_s12 = int_to_ptr.vmem [resolvable:$false] %s1742_s12 }
  0xfb   : > { %v1117_v27 = vmul.f32 %v1116_v28, %v1106_v3  ;;  %v1113_v26 = vmul.f32 %v1112_v37, %v1106_v3  ;;  %v1128_v60 = vstv %s2575_s16  ;;  %v1811_v17 = vmov 0.0   ;;  %s1738_s8 = scalar_lea.vmem %s2606_s6, 768  ;;  %s1744_s14 = scalar_lea.vmem %s1743_s12, 1536 }
  0xfc   : > { %v991_v10 = vadd.f32 %v990_v57, %v972_v24  ;;  %v1026_v9 = vadd.f32 %v1025_v59, %v1003_v42  ;;  %v995_v13 = vadd.f32 %v994_v61, %v980_v58  ;;  %v1124_v61 = vstv %s1590_s17  ;;  %1621 = vmatprep.subr.bf16.mxu1 %v1811_v17  ;;  %1627 = vmatprep.subr.bf16.mxu0 %v1811_v17  ;;  %p1739_p10 = scmp.ne.s32.totalorder %s2606_s6, %s1738_s8  ;;  %p1745_p8 = scmp.lt.s32.totalorder %s2606_s6, %s1743_s12 }
  0xfd   : > { %1623 = vmatprep.mubr.msk.bf16.mxu1 %vm1812_vm3, %v1811_v17  ;;  %p1746_p11 = scmp.lt.s32.totalorder %s1744_s14, %s1738_s8 }
  0xfe   : > { %v1011_v49 = vadd.f32 %v1009_v31, %v991_v10  ;;  %v1042_v56 = vadd.f32 %v1040_v63, %v1026_v9  ;;  %v1019_v11 = vadd.f32 %v1017_v1, %v995_v13  ;;  %v1707_v13 = vld [vmem:[%s2657_s3] sm:$0xff]   ;;  %p1740_p0 = pnand %p1739_p10, %p2672_p12 }
  0xff   : > { %p1747_p13 = por %p1746_p11, %p1745_p8 }
 0x100   : > { %v1065_v50 = vadd.f32 %v1064_v52, %v1042_v56  ;;  %v1034_v36 = vadd.f32 %v1033_v2, %v1019_v11  ;;  %v1030_v48 = vadd.f32 %v1029_v14, %v1011_v49  ;;  %p1741_p7 = pneg %p1740_p0 }
 0x102   : > { %v1080_v4 = vadd.f32 %v1079_v32, %v1065_v50  ;;  %v1058_v29 = vadd.f32 %v1056_v7, %v1034_v36  ;;  %v1050_v31 = vadd.f32 %v1048_v0, %v1030_v48  ;;  %p1748_p1 = pnand %p1747_p13, %p1741_p7 }
 0x104   : > { %v1095_v40 = vadd.f32 %v1094_v18, %v1080_v4  ;;  %v1073_v46 = vadd.f32 %v1072_v20, %v1058_v29  ;;  %v1069_v22 = vadd.f32 %v1068_v23, %v1050_v31 }
 0x106   : > { %v1110_v44 = vadd.f32 %v1109_v51, %v1095_v40  ;;  %v1088_v54 = vadd.f32 %v1087_v25, %v1073_v46  ;;  %v1084_v12 = vadd.f32 %v1083_v62, %v1069_v22 }
 0x108   : > { %v1121_v35 = vadd.f32 %v1120_v55, %v1110_v44  ;;  %v1103_v57 = vadd.f32 %v1102_v38, %v1088_v54  ;;  %v1099_v59 = vadd.f32 %v1098_v47, %v1084_v12 }
 0x10a   : > { %v1122_v15 = vmax.f32 %v1121_v35, 0.0  ;;  %v1118_v39 = vadd.f32 %v1117_v27, %v1103_v57  ;;  %v1114_v19 = vadd.f32 %v1113_v26, %v1099_v59 }
 0x10c   : > { %1132 = vst.msk [vmem:[#allocation2] sm:$0xff] %vm1131_vm2, %v1122_v15  ;;  %v1129_v45 = vadd.f32 %v1128_v60, %v1118_v39  ;;  %v1125_v16 = vadd.f32 %v1124_v61, %v1114_v19 }
 0x10e   : > { %v1130_v34 = vmax.f32 %v1129_v45, 0.0  ;;  %v1126_v63 = vmax.f32 %v1125_v16, 0.0 }
 0x110   : > { %1134 = vst.msk [vmem:[#allocation2 + $0x10] sm:$0xff] %vm1131_vm2, %v1130_v34  ;;  %1133 = vst.msk [vmem:[#allocation2 + $0x8] sm:$0xff] %vm1131_vm2, %v1126_v63 }
 0x113   : > { %v1135_v1 = vld [vmem:[#allocation2] sm:$0xff] }
 0x117   : > { %v1136_v6 = vld [vmem:[#allocation2 + $0x8] sm:$0xff]  ;;  %v1137_v58 = vld [vmem:[#allocation2 + $0x10] sm:$0xff] }
 0x118   : > { %v1138_v24 = vpack.c.bf16 %v1136_v6, %v1135_v1  ;;  %v1139_v42 = vpack.c.bf16 %v1137_v58, %v1137_v58 }
 0x11a   : > { %1617 = vmatprep.mubr.msk.bf16.mxu0 %vm1131_vm2, %v1138_v24 }
 0x11b   : > { %1618 = vmatmul.mubr.msk.bf16.vlgmr.msra.gmra.mxu0 %vm1131_vm2, %v1139_v42 }
 0x11c   : > { %1629 = vmatprep.mubr.msk.bf16.mxu0 %vm1812_vm3, %v1811_v17 }
 0x1db   : > { %v1619_v52 = vpop.f32.mrf.mxu0 }
 0x1dc   : > { %v1305_v10 = vpack.c.bf16 %v1619_v52, %v1619_v52 }
 0x1dd   : > { %v1185_v5 = vpop.f32.mrf.mxu0 }
 0x1de   : > { %v1201_v2 = vpack.c.bf16 %v1185_v5, %v1185_v5  ;;  %v1307_v3 = vsel %vm1147_vm1, %v1305_v10, 0 }
 0x1df   : > { %v1620_v8 = vpop.f32.mrf.mxu0 }
 0x1e0   : > { %v1211_v9 = vsel %vm1147_vm1, %v1201_v2, 0 }
 0x1e1   : > { %v1188_v14 = vpop.f32.mrf.mxu0  ;;  %1622 = vmatpush3.bf16.msra.mxu1 %v1211_v9 }
 0x1e2   : > { %v1257_v32 = vpack.c.bf16 %v1188_v14, %v1188_v14  ;;  %1633 = vmatprep.subr.bf16.mxu1 %v1811_v17 }
 0x1e4   : > { %v1259_v41 = vsel %vm1147_vm1, %v1257_v32, 0  ;;  %1624 = vmatmul.mubr.msk.bf16.vlgmr.msra.gmra.mxu1 %vm1131_vm2, %v1707_v13 }
 0x1e5   : > { %1628 = vmatpush3.bf16.msra.mxu0 %v1259_v41  ;;  %1634 = vmatpush3.bf16.msra.mxu1 %v1307_v3 }
 0x1e6   : > { %1635 = vmatprep.mubr.msk.bf16.mxu1 %vm1812_vm3, %v1811_v17 }
 0x1e8   : > { %1630 = vmatmul.mubr.msk.bf16.vlgmr.msra.gmra.mxu0 %vm1131_vm2, %v1707_v13 }
 0x1ec   : > { %1636 = vmatmul.mubr.msk.bf16.vlgmr.msra.gmra.mxu1 %vm1131_vm2, %v1707_v13 }
 0x2a4   : > { %v1247_v33 = vpop.f32.mrf.mxu1 }
 0x2a5   : > { %1255 = vst.msk [vmem:[%s244_s26] sm:$0xff] %vm1254_vm4, %v1247_v33 }
 0x2a6   : > { %v1625_v49 = vpop.f32.mrf.mxu1 }
 0x2a8   : > { %v1250_v56 = vpop.f32.mrf.mxu1  ;;  %v1295_v11 = vpop.f32.mrf.mxu0 }
 0x2a9   : > { %1256 = vst.msk [vmem:[%s244_s26 + $0x8] sm:$0xff] %vm1254_vm4, %v1250_v56  ;;  %1597 = vst.msk [vmem:[%s244_s26 + $0x10] sm:$0xff] %vm1254_vm4, %v1295_v11 }
 0x2aa   : > { %v1626_v53 = vpop.f32.mrf.mxu1  ;;  %v1631_v18 = vpop.f32.mrf.mxu0 }
 0x2ac   : > { %v1298_v20 = vpop.f32.mrf.mxu0  ;;  %v1343_v30 = vpop.f32.mrf.mxu1 }
 0x2ad   : > { %1598 = vst.msk [vmem:[%s244_s26 + $0x18] sm:$0xff] %vm1254_vm4, %v1298_v20  ;;  %1600 = vst.msk [vmem:[%s244_s26 + $0x20] sm:$0xff] %vm1254_vm4, %v1343_v30 }
 0x2ae   : > { %v1632_v7 = vpop.f32.mrf.mxu0  ;;  %v1637_v21 = vpop.f32.mrf.mxu1 }
 0x2b0   : > { %v1346_v0 = vpop.f32.mrf.mxu1 }
 0x2b1   : > { %1601 = vst.msk [vmem:[%s244_s26 + $0x28] sm:$0xff] %vm1254_vm4, %v1346_v0 }
 0x2b2   : > { %v1638_v50 = vpop.f32.mrf.mxu1 }
 0x2b3   : > { %1751 = shalt.err (!%p1748_p1)
}
 0x2b4   : > { %s1752_s16 = scalar_lea.hbm %s2611_s10, 768  ;;  %s1756_s13 = scalar_lea.hbm %s2659_s5, 1536 }
 0x2b5   : > { %p1753_p2 = scmp.ne.s32.totalorder %s2611_s10, %s1752_s16  ;;  %p1757_p9 = scmp.lt.s32.totalorder %s2611_s10, %s2659_s5 }
 0x2b6   : > { %p1758_p5 = scmp.lt.s32.totalorder %s1756_s13, %s1752_s16 }
 0x2b7   : > { %p1754_p3 = pnand %p1753_p2, %p2672_p12 }
 0x2b8   : > { %p1759_p6 = por %p1758_p5, %p1757_p9 }
 0x2b9   : > { %p1755_p4 = pneg %p1754_p3 }
 0x2bb   : > { %p1760_p10 = pnand %p1759_p6, %p1755_p4 }
 0x2bd   : > { %1763 = shalt.err (!%p1760_p10)
}
 0x2be   : > { %s1814_s26 = smov 128   ;;  %s1815_s30 = smov 8  }
 0x2bf   : > { %1650 = dma.vmem_to_hbm [thread:$0]  (%p2672_p12), %s2606_s6, 768, %s2611_s10, %s2614_s22, %s1814_s26, %s1814_s26, %s1815_s30  }
 0x2c0 PF: > { %p1667_p0 = scmp.ge.s32.totalorder %s1806_s21, 2  ;;  %s1382_s7 = sand.u32 1, %s1794_s18  }
 0x2c1   : > { %p2673_p7 = scmp.ne.s32.totalorder %s2664_s29, 0  ;;  %s1383_s9 = scalar_lea.sflag [#allocation4], %s1382_s7 }
 0x2c3   : > { %p1660_p8 = pnand %p1667_p0, %p2673_p7 }
 0x2c5   : > { %p1661_p11 = pneg %p1660_p8 }
 0x2c7   : > { %1789 = dma.done.wait (%p1661_p11), %s1383_s9, 768  }
 0x2c8   : > { %1791 = vsyncadd (%p1661_p11), %s1383_s9, 4294966528  ;;  %p17_p13 = scmp.ge.s32.totalorder %s1871_s24, 4   ;;  %s2674_s18 = smov %s1798_s19 }
 0x2c9   : > { %s2675_s19 = smov %s1802_s20  ;;  %s2676_s20 = smov %s1882_s27 }
 0x2ca   : > { %s2677_s21 = smov %s1871_s24  ;;  %19 = sbr.rel (!%p17_p13) target bundleno = 5 (0x5), region = 101 }
 0x2cf   :  { %1388 = vsyncpa [#allocation4], 1 }
 0x2d0   :  { %1390 = vsyncpa [#allocation4 + $0x1], 1 }
 0x2d1   :  { %1391 = vsyncpa [#allocation5], 1 }
 0x2d2   :  { %1393 = vsyncpa [#allocation5 + $0x1], 1 }
 0x2d3   :  { %1394 = vsyncpa [#allocation7], 1 }

</bundles_post_ra>
